<compile_context>
chip_gen: v6e
topology: v6e:2x2x1
jax: 0.10.0
libtpu: 0.0.40
codegen_flags: <defaults>
</compile_context>

<pallas_src>
import functools

import jax
import jax.numpy as jnp
from jax.experimental import pallas as pl
from jax.experimental.pallas import tpu as pltpu

EPS = 1e-5
NEG_SLOPE = 0.01              # nn.LeakyReLU() default negative_slope
COMPUTE_DTYPE = jnp.bfloat16  # MXU / streamed-input dtype (accumulation & affine stay f32)


def _round_up(a, b):
    return -(-a // b) * b


def _divisors(n):
    return [d for d in range(1, n + 1) if n % d == 0]


def _pick_th(ho, wo, n_batch, *, target_lanes=1024, max_unroll=16):
    """Output rows handled per grid step.  TH*Wo (the output tile lane width) must be a
    multiple of 128, or TH == Ho (tile == full spatial extent)."""
    cands = [d for d in _divisors(ho) if (d * wo) % 128 == 0 and d <= max_unroll]
    good = [d for d in cands if d * wo <= target_lanes]
    if good:
        th = max(good)
    elif cands:
        th = min(cands)
    else:
        th = ho
    # v7x has 2 TensorCores: keep at least 2 grid steps when the batch alone does not.
    if n_batch * (ho // th) < 2:
        alt = [d for d in _divisors(ho) if d < ho and (d * wo) % 128 == 0]
        if alt:
            th = max(alt)
    return th


def _vmem_budget_bytes():
    cap = 64 * 1024 * 1024  # conservative fallback == v7x per-core physical VMEM
    try:
        cap = int(pltpu.get_tpu_info().vmem_capacity_bytes)
    except Exception:
        pass
    return max(cap * 3 // 4, 16 * 1024 * 1024)


def _conv_stats_kernel(w_ref, a_ref, ax_ref, conv_ref, sum_ref, sq_ref, *, C, TH, Wo):
    """Pass 1: in-kernel-tap conv (lane-dense, C on sublanes) + per-tile BN partial stats.

    w_ref:    (3, C, 3C)        bf16, [kh] = [ W[:,:,kh,0] | W[:,:,kh,1] | W[:,:,kh,2] ]
    a_ref:    (1, 2*TH, 2C, Wc) bf16, padded rows [2*TH*b, 2*TH*(b+1)); row layout
                                 [pw*C + ci, wc] = xpad[ci, 2*wc + pw]  (column-phase split)
    ax_ref:   (1, 1, 2C, Wc)    bf16, padded row 2*TH*(b+1) (kh=2 tap of the last block row)
    conv_ref: (1, C, TH*Wo)     bf16 conv output tile (flattened NCHW spatial on lanes)
    sum_ref:  (1, 1, C, 1)      f32 per-tile per-channel sum
    sq_ref:   (1, 1, C, 1)      f32 per-tile per-channel sum of squares
    """
    csum = jnp.zeros((C, 1), jnp.float32)
    csq = jnp.zeros((C, 1), jnp.float32)
    for j in range(TH):                           # static unroll over output rows in the tile
        acc = jnp.zeros((C, Wo), jnp.float32)
        for kh in range(3):
            r = 2 * j + kh                        # row inside the fetched window
            plane = a_ref[0, r] if r < 2 * TH else ax_ref[0, 0]     # (2C, Wc)
            wa = w_ref[kh, :, : 2 * C]            # (C, 2C)  -> taps kw=0 (phase 0), kw=1 (phase 1)
            wb = w_ref[kh, :, 2 * C:]             # (C, C)   -> tap  kw=2 (phase 0, +1 column)
            acc = acc + jnp.dot(wa, plane[:, :Wo],
                                preferred_element_type=jnp.float32)
            acc = acc + jnp.dot(wb, plane[:C, 1:1 + Wo],
                                preferred_element_type=jnp.float32)
        conv_ref[0, :, j * Wo:(j + 1) * Wo] = acc.astype(conv_ref.dtype)
        csum = csum + jnp.sum(acc, axis=1, keepdims=True)
        csq = csq + jnp.sum(acc * acc, axis=1, keepdims=True)
    sum_ref[0, 0] = csum
    sq_ref[0, 0] = csq


def _bn_lrelu_kernel(affine_ref, conv_ref, out_ref):
    """Pass 2: y = conv*scale + shift, LeakyReLU.  Pure HBM-bandwidth-bound sweep."""
    scale = affine_ref[0]                         # (C, 1) f32, resident block
    shift = affine_ref[1]
    y = conv_ref[0].astype(jnp.float32) * scale + shift
    out_ref[0] = jnp.where(y >= 0, y, NEG_SLOPE * y).astype(out_ref.dtype)


def downsample(x, weight, gamma, beta, *, target_lanes=1024):
    """Conv2d(C,C,k=3,s=2,p=1,reflect,bias=False) -> BatchNorm2d (batch stats) -> LeakyReLU.

    x: (N, C, H, W) f32 (NCHW, like PyTorch); weight: (C, C, 3, 3); gamma/beta: (C,).
    Returns (N, C, Ho, Wo) f32."""
    N, C, H, W = x.shape
    Ho = (H + 2 - 3) // 2 + 1
    Wo = (W + 2 - 3) // 2 + 1
    Wc = Wo + 1                                   # half-row width after column-phase split
    S = Ho * Wo

    TH = _pick_th(Ho, Wo, N, target_lanes=target_lanes)
    B = Ho // TH
    TILE = TH * Wo

    # ---- glue: reflect pad, cast bf16, column-phase split (stride-2 taps -> contiguous
    # lane slices), channels onto sublanes, padded rows as a leading dim.  One O(input) copy.
    xpad = jnp.pad(x, ((0, 0), (0, 0), (1, 1), (1, 1)), mode="reflect")   # (N, C, H+2, W+2)
    Hp_arr, Wp_arr = 2 * Ho + 2, 2 * Wc
    pad_h, pad_w = Hp_arr - (H + 2), Wp_arr - (W + 2)
    if pad_h or pad_w:
        xpad = jnp.pad(xpad, ((0, 0), (0, 0), (0, pad_h), (0, pad_w)))
    xb = xpad.astype(COMPUTE_DTYPE)
    xc = xb.reshape(N, C, Hp_arr, Wc, 2)
    xc = jnp.transpose(xc, (0, 2, 4, 1, 3)).reshape(N, Hp_arr, 2 * C, Wc)
    # xc[n, r, pw*C + ci, wc] == xpad[n, ci, r, 2*wc + pw]

    # ---- glue: weights -> (3, C, 3C): wcat[kh, :, kw*C + ci] = weight[:, ci, kh, kw]
    wt = jnp.transpose(weight, (2, 3, 0, 1)).astype(COMPUTE_DTYPE)        # (3, 3, C, C)
    wcat = jnp.concatenate([wt[:, 0], wt[:, 1], wt[:, 2]], axis=2)        # (3, C, 3C)

    # ---- VMEM sizing (double-buffered blocks + resident weights), generation-aware cap ----
    blk_in = (2 * TH + 1) * _round_up(2 * C, 8) * _round_up(Wc, 128) * 2
    blk_conv = _round_up(C, 8) * _round_up(TILE, 128) * 2
    blk_stats = 2 * _round_up(C, 8) * 128 * 4
    w_res = 3 * _round_up(C, 8) * _round_up(3 * C, 128) * 2
    vmem_est = 2 * (blk_in + blk_conv + blk_stats) + 2 * w_res
    vmem_limit = int(min(max(4 * vmem_est, 32 * 1024 * 1024), _vmem_budget_bytes()))

    # ---- pass 1: conv (in-kernel taps) + per-tile BN partial statistics ----
    conv_flat, tsum, tsq = pl.pallas_call(
        functools.partial(_conv_stats_kernel, C=C, TH=TH, Wo=Wo),
        grid=(N, B),
        out_shape=(
            jax.ShapeDtypeStruct((N, C, S), COMPUTE_DTYPE),
            jax.ShapeDtypeStruct((N, B, C, 1), jnp.float32),
            jax.ShapeDtypeStruct((N, B, C, 1), jnp.float32),
        ),
        in_specs=[
            pl.BlockSpec((3, C, 3 * C), lambda n, b: (0, 0, 0)),
            pl.BlockSpec((1, 2 * TH, 2 * C, Wc), lambda n, b: (n, b, 0, 0)),
            pl.BlockSpec((1, 1, 2 * C, Wc), lambda n, b: (n, 2 * TH * (b + 1), 0, 0)),
        ],
        out_specs=(
            pl.BlockSpec((1, C, TILE), lambda n, b: (n, 0, b)),
            pl.BlockSpec((1, 1, C, 1), lambda n, b: (n, b, 0, 0)),
            pl.BlockSpec((1, 1, C, 1), lambda n, b: (n, b, 0, 0)),
        ),
        compiler_params=pltpu.CompilerParams(
            dimension_semantics=("parallel", "parallel"),
            vmem_limit_bytes=vmem_limit,
        ),
        cost_estimate=pl.CostEstimate(
            flops=2 * N * S * 9 * C * C,
            transcendentals=0,
            bytes_accessed=int(xc.size * 2 + N * C * S * 2 + wcat.size * 2),
        ),
    )(wcat, xc, xc)

    # ---- glue: finalize batch stats (f32), fold BN into one scale/shift per channel ----
    M = N * S
    total = jnp.sum(tsum, axis=(0, 1))[:, 0]                     # (C,)
    total_sq = jnp.sum(tsq, axis=(0, 1))[:, 0]                   # (C,)
    mean = total / M
    var = jnp.maximum(total_sq / M - mean * mean, 0.0)           # biased (training-mode) variance
    scale = gamma.astype(jnp.float32) * jax.lax.rsqrt(var + EPS)
    shift = beta.astype(jnp.float32) - mean * scale
    affine = jnp.stack([scale, shift], axis=0).reshape(2, C, 1)

    # ---- pass 2: normalize + LeakyReLU, written directly in flattened NCHW ----
    out_flat = pl.pallas_call(
        _bn_lrelu_kernel,
        grid=(N, B),
        out_shape=jax.ShapeDtypeStruct((N, C, S), jnp.float32),
        in_specs=[
            pl.BlockSpec((2, C, 1), lambda n, b: (0, 0, 0)),
            pl.BlockSpec((1, C, TILE), lambda n, b: (n, 0, b)),
        ],
        out_specs=pl.BlockSpec((1, C, TILE), lambda n, b: (n, 0, b)),
        compiler_params=pltpu.CompilerParams(
            dimension_semantics=("parallel", "parallel"),
            vmem_limit_bytes=vmem_limit,
        ),
        cost_estimate=pl.CostEstimate(
            flops=3 * N * C * S,
            transcendentals=0,
            bytes_accessed=int(N * C * S * (2 + 4)),
        ),
    )(affine, conv_flat)

    return out_flat.reshape(N, C, Ho, Wo)   # free reshape, no transpose


def _reference(x, weight, gamma, beta):
    """Pure JAX/XLA reference of the PyTorch module (f32) for a sanity check."""
    xp = jnp.pad(x, ((0, 0), (0, 0), (1, 1), (1, 1)), mode="reflect")
    conv = jax.lax.conv_general_dilated(
        xp, weight, window_strides=(2, 2), padding="VALID",
        dimension_numbers=("NCHW", "OIHW", "NCHW"))
    mean = jnp.mean(conv, axis=(0, 2, 3), keepdims=True)
    var = jnp.mean((conv - mean) ** 2, axis=(0, 2, 3), keepdims=True)
    y = (conv - mean) * jax.lax.rsqrt(var + EPS)
    y = y * gamma.reshape(1, -1, 1, 1) + beta.reshape(1, -1, 1, 1)
    return jnp.where(y >= 0, y, NEG_SLOPE * y)


if __name__ == "__main__":
    key = jax.random.PRNGKey(0)
    k_x, k_w, k_g, k_b = jax.random.split(key, 4)

    N, C, H, W = 2, 4, 16, 16
    x = jax.random.normal(k_x, (N, C, H, W), dtype=jnp.float32)
    weight = jax.random.normal(k_w, (C, C, 3, 3), dtype=jnp.float32) * 0.1
    gamma = jax.random.normal(k_g, (C,), dtype=jnp.float32) * 0.1 + 1.0
    beta = jax.random.normal(k_b, (C,), dtype=jnp.float32) * 0.1

    fn = jax.jit(downsample)
    out = fn(x, weight, gamma, beta)
    jax.block_until_ready(out)
    assert out.shape == (N, C, H // 2, W // 2)

    # Loose tolerance: conv taps / weights / intermediate are bf16 (stats & affine stay f32).
    ref = _reference(x, weight, gamma, beta)
    max_err = float(jnp.max(jnp.abs(out - ref)))
    assert max_err < 0.1, f"max abs error vs reference too large: {max_err}"

    print("KERNEL_OK")
</pallas_src>

<mosaic_0001>
module attributes {stable_mosaic.version = 11 : i64} {
  func.func @_conv_stats_kernel(%arg0: i32, %arg1: i32, %arg2: memref<3x4x12xbf16, #tpu.memory_space<vmem>>, %arg3: memref<1x16x8x9xbf16, #tpu.memory_space<vmem>>, %arg4: memref<1x1x8x9xbf16, #tpu.memory_space<vmem>>, %arg5: memref<1x4x64xbf16, #tpu.memory_space<vmem>>, %arg6: memref<1x1x4x1xf32, #tpu.memory_space<vmem>>, %arg7: memref<1x1x4x1xf32, #tpu.memory_space<vmem>>) attributes {dimension_semantics = [#tpu.dimension_semantics<parallel>, #tpu.dimension_semantics<parallel>], iteration_bounds = array<i64: 2, 1>, scalar_prefetch = 0 : i64, scratch_operands = 0 : i64, tpu.core_type = #tpu.core_type<tc>, window_params = [{pipeline_mode = #tpu.pipeline_mode<synchronous>, transform_indices = @transform_0, window_bounds = array<i64: 3, 4, 12>}, {transform_indices = @transform_1, window_bounds = array<i64: 1, 16, 8, 9>}, {transform_indices = @transform_2, window_bounds = array<i64: 1, 1, 8, 9>}, {transform_indices = @transform_3, window_bounds = array<i64: 1, 4, 64>}, {transform_indices = @transform_4, window_bounds = array<i64: 1, 1, 4, 1>}, {transform_indices = @transform_5, window_bounds = array<i64: 1, 1, 4, 1>}]} {
    %cst = arith.constant 0.000000e+00 : f32
    %0 = vector.broadcast %cst : f32 to vector<4x1xf32>
    %cst_0 = arith.constant 0.000000e+00 : f32
    %1 = vector.broadcast %cst_0 : f32 to vector<4x1xf32>
    %cst_1 = arith.constant 0.000000e+00 : f32
    %2 = vector.broadcast %cst_1 : f32 to vector<4x8xf32>
    %c0 = arith.constant 0 : index
    %c0_2 = arith.constant 0 : index
    %c0_3 = arith.constant 0 : index
    %c0_4 = arith.constant 0 : index
    %3 = vector.load %arg3[%c0, %c0_2, %c0_3, %c0_4] : memref<1x16x8x9xbf16, #tpu.memory_space<vmem>>, vector<1x1x8x9xbf16>
    %4 = vector.shape_cast %3 : vector<1x1x8x9xbf16> to vector<8x9xbf16>
    %c0_5 = arith.constant 0 : index
    %c0_6 = arith.constant 0 : index
    %c0_7 = arith.constant 0 : index
    %5 = vector.load %arg2[%c0_5, %c0_6, %c0_7] : memref<3x4x12xbf16, #tpu.memory_space<vmem>>, vector<1x4x8xbf16>
    %6 = vector.shape_cast %5 : vector<1x4x8xbf16> to vector<4x8xbf16>
    %c0_8 = arith.constant 0 : index
    %c0_9 = arith.constant 0 : index
    %c8 = arith.constant 8 : index
    %7 = vector.load %arg2[%c0_8, %c0_9, %c8] : memref<3x4x12xbf16, #tpu.memory_space<vmem>>, vector<1x4x4xbf16>
    %8 = vector.shape_cast %7 : vector<1x4x4xbf16> to vector<4x4xbf16>
    %9 = vector.extract_strided_slice %4 {offsets = [0, 0], sizes = [8, 8], strides = [1, 1]} : vector<8x9xbf16> to vector<8x8xbf16>
    %cst_10 = arith.constant dense<0.000000e+00> : vector<4x8xf32>
    %10 = tpu.matmul %6, %9, %cst_10 {dimension_numbers = #tpu.dot_dimension_numbers<[1], [0], [0], [1], [0, 0, 1, 1], [], []>} : vector<4x8xbf16>, vector<8x8xbf16>, vector<4x8xf32> -> vector<4x8xf32>
    %11 = arith.addf %2, %10 : vector<4x8xf32>
    %12 = vector.extract_strided_slice %4 {offsets = [0, 1], sizes = [4, 8], strides = [1, 1]} : vector<8x9xbf16> to vector<4x8xbf16>
    %cst_11 = arith.constant dense<0.000000e+00> : vector<4x8xf32>
    %13 = tpu.matmul %8, %12, %cst_11 {dimension_numbers = #tpu.dot_dimension_numbers<[1], [0], [0], [1], [0, 0, 1, 1], [], []>} : vector<4x4xbf16>, vector<4x8xbf16>, vector<4x8xf32> -> vector<4x8xf32>
    %14 = arith.addf %11, %13 : vector<4x8xf32>
    %c0_12 = arith.constant 0 : index
    %c1 = arith.constant 1 : index
    %c0_13 = arith.constant 0 : index
    %c0_14 = arith.constant 0 : index
    %15 = vector.load %arg3[%c0_12, %c1, %c0_13, %c0_14] : memref<1x16x8x9xbf16, #tpu.memory_space<vmem>>, vector<1x1x8x9xbf16>
    %16 = vector.shape_cast %15 : vector<1x1x8x9xbf16> to vector<8x9xbf16>
    %c1_15 = arith.constant 1 : index
    %c0_16 = arith.constant 0 : index
    %c0_17 = arith.constant 0 : index
    %17 = vector.load %arg2[%c1_15, %c0_16, %c0_17] : memref<3x4x12xbf16, #tpu.memory_space<vmem>>, vector<1x4x8xbf16>
    %18 = vector.shape_cast %17 : vector<1x4x8xbf16> to vector<4x8xbf16>
    %c1_18 = arith.constant 1 : index
    %c0_19 = arith.constant 0 : index
    %c8_20 = arith.constant 8 : index
    %19 = vector.load %arg2[%c1_18, %c0_19, %c8_20] : memref<3x4x12xbf16, #tpu.memory_space<vmem>>, vector<1x4x4xbf16>
    %20 = vector.shape_cast %19 : vector<1x4x4xbf16> to vector<4x4xbf16>
    %21 = vector.extract_strided_slice %16 {offsets = [0, 0], sizes = [8, 8], strides = [1, 1]} : vector<8x9xbf16> to vector<8x8xbf16>
    %cst_21 = arith.constant dense<0.000000e+00> : vector<4x8xf32>
    %22 = tpu.matmul %18, %21, %cst_21 {dimension_numbers = #tpu.dot_dimension_numbers<[1], [0], [0], [1], [0, 0, 1, 1], [], []>} : vector<4x8xbf16>, vector<8x8xbf16>, vector<4x8xf32> -> vector<4x8xf32>
    %23 = arith.addf %14, %22 : vector<4x8xf32>
    %24 = vector.extract_strided_slice %16 {offsets = [0, 1], sizes = [4, 8], strides = [1, 1]} : vector<8x9xbf16> to vector<4x8xbf16>
    %cst_22 = arith.constant dense<0.000000e+00> : vector<4x8xf32>
    %25 = tpu.matmul %20, %24, %cst_22 {dimension_numbers = #tpu.dot_dimension_numbers<[1], [0], [0], [1], [0, 0, 1, 1], [], []>} : vector<4x4xbf16>, vector<4x8xbf16>, vector<4x8xf32> -> vector<4x8xf32>
    %26 = arith.addf %23, %25 : vector<4x8xf32>
    %c0_23 = arith.constant 0 : index
    %c2 = arith.constant 2 : index
    %c0_24 = arith.constant 0 : index
    %c0_25 = arith.constant 0 : index
    %27 = vector.load %arg3[%c0_23, %c2, %c0_24, %c0_25] : memref<1x16x8x9xbf16, #tpu.memory_space<vmem>>, vector<1x1x8x9xbf16>
    %28 = vector.shape_cast %27 : vector<1x1x8x9xbf16> to vector<8x9xbf16>
    %c2_26 = arith.constant 2 : index
    %c0_27 = arith.constant 0 : index
    %c0_28 = arith.constant 0 : index
    %29 = vector.load %arg2[%c2_26, %c0_27, %c0_28] : memref<3x4x12xbf16, #tpu.memory_space<vmem>>, vector<1x4x8xbf16>
    %30 = vector.shape_cast %29 : vector<1x4x8xbf16> to vector<4x8xbf16>
    %c2_29 = arith.constant 2 : index
    %c0_30 = arith.constant 0 : index
    %c8_31 = arith.constant 8 : index
    %31 = vector.load %arg2[%c2_29, %c0_30, %c8_31] : memref<3x4x12xbf16, #tpu.memory_space<vmem>>, vector<1x4x4xbf16>
    %32 = vector.shape_cast %31 : vector<1x4x4xbf16> to vector<4x4xbf16>
    %33 = vector.extract_strided_slice %28 {offsets = [0, 0], sizes = [8, 8], strides = [1, 1]} : vector<8x9xbf16> to vector<8x8xbf16>
    %cst_32 = arith.constant dense<0.000000e+00> : vector<4x8xf32>
    %34 = tpu.matmul %30, %33, %cst_32 {dimension_numbers = #tpu.dot_dimension_numbers<[1], [0], [0], [1], [0, 0, 1, 1], [], []>} : vector<4x8xbf16>, vector<8x8xbf16>, vector<4x8xf32> -> vector<4x8xf32>
    %35 = arith.addf %26, %34 : vector<4x8xf32>
    %36 = vector.extract_strided_slice %28 {offsets = [0, 1], sizes = [4, 8], strides = [1, 1]} : vector<8x9xbf16> to vector<4x8xbf16>
    %cst_33 = arith.constant dense<0.000000e+00> : vector<4x8xf32>
    %37 = tpu.matmul %32, %36, %cst_33 {dimension_numbers = #tpu.dot_dimension_numbers<[1], [0], [0], [1], [0, 0, 1, 1], [], []>} : vector<4x4xbf16>, vector<4x8xbf16>, vector<4x8xf32> -> vector<4x8xf32>
    %38 = arith.addf %35, %37 : vector<4x8xf32>
    %39 = arith.truncf %38 : vector<4x8xf32> to vector<4x8xbf16>
    %c0_34 = arith.constant 0 : index
    %c0_35 = arith.constant 0 : index
    %c0_36 = arith.constant 0 : index
    %40 = vector.load %arg5[%c0_34, %c0_35, %c0_36] : memref<1x4x64xbf16, #tpu.memory_space<vmem>>, vector<1x4x8xbf16>
    %41 = vector.shape_cast %40 : vector<1x4x8xbf16> to vector<4x8xbf16>
    %42 = vector.shape_cast %39 : vector<4x8xbf16> to vector<1x4x8xbf16>
    tpu.vector_store %arg5[%c0_34, %c0_35, %c0_36], %42 {strides = array<i32>} : memref<1x4x64xbf16, #tpu.memory_space<vmem>>, vector<1x4x8xbf16>,
    %cst_37 = arith.constant dense<0.000000e+00> : vector<4xf32>
    %43 = vector.multi_reduction <add>, %38, %cst_37 [1] : vector<4x8xf32> to vector<4xf32>
    %44 = vector.shape_cast %43 : vector<4xf32> to vector<4x1xf32>
    %45 = arith.addf %0, %44 : vector<4x1xf32>
    %46 = arith.mulf %38, %38 : vector<4x8xf32>
    %cst_38 = arith.constant dense<0.000000e+00> : vector<4xf32>
    %47 = vector.multi_reduction <add>, %46, %cst_38 [1] : vector<4x8xf32> to vector<4xf32>
    %48 = vector.shape_cast %47 : vector<4xf32> to vector<4x1xf32>
    %49 = arith.addf %1, %48 : vector<4x1xf32>
    %cst_39 = arith.constant 0.000000e+00 : f32
    %50 = vector.broadcast %cst_39 : f32 to vector<4x8xf32>
    %c0_40 = arith.constant 0 : index
    %c2_41 = arith.constant 2 : index
    %c0_42 = arith.constant 0 : index
    %c0_43 = arith.constant 0 : index
    %51 = vector.load %arg3[%c0_40, %c2_41, %c0_42, %c0_43] : memref<1x16x8x9xbf16, #tpu.memory_space<vmem>>, vector<1x1x8x9xbf16>
    %52 = vector.shape_cast %51 : vector<1x1x8x9xbf16> to vector<8x9xbf16>
    %c0_44 = arith.constant 0 : index
    %c0_45 = arith.constant 0 : index
    %c0_46 = arith.constant 0 : index
    %53 = vector.load %arg2[%c0_44, %c0_45, %c0_46] : memref<3x4x12xbf16, #tpu.memory_space<vmem>>, vector<1x4x8xbf16>
    %54 = vector.shape_cast %53 : vector<1x4x8xbf16> to vector<4x8xbf16>
    %c0_47 = arith.constant 0 : index
    %c0_48 = arith.constant 0 : index
    %c8_49 = arith.constant 8 : index
    %55 = vector.load %arg2[%c0_47, %c0_48, %c8_49] : memref<3x4x12xbf16, #tpu.memory_space<vmem>>, vector<1x4x4xbf16>
    %56 = vector.shape_cast %55 : vector<1x4x4xbf16> to vector<4x4xbf16>
    %57 = vector.extract_strided_slice %52 {offsets = [0, 0], sizes = [8, 8], strides = [1, 1]} : vector<8x9xbf16> to vector<8x8xbf16>
    %cst_50 = arith.constant dense<0.000000e+00> : vector<4x8xf32>
    %58 = tpu.matmul %54, %57, %cst_50 {dimension_numbers = #tpu.dot_dimension_numbers<[1], [0], [0], [1], [0, 0, 1, 1], [], []>} : vector<4x8xbf16>, vector<8x8xbf16>, vector<4x8xf32> -> vector<4x8xf32>
    %59 = arith.addf %50, %58 : vector<4x8xf32>
    %60 = vector.extract_strided_slice %52 {offsets = [0, 1], sizes = [4, 8], strides = [1, 1]} : vector<8x9xbf16> to vector<4x8xbf16>
    %cst_51 = arith.constant dense<0.000000e+00> : vector<4x8xf32>
    %61 = tpu.matmul %56, %60, %cst_51 {dimension_numbers = #tpu.dot_dimension_numbers<[1], [0], [0], [1], [0, 0, 1, 1], [], []>} : vector<4x4xbf16>, vector<4x8xbf16>, vector<4x8xf32> -> vector<4x8xf32>
    %62 = arith.addf %59, %61 : vector<4x8xf32>
    %c0_52 = arith.constant 0 : index
    %c3 = arith.constant 3 : index
    %c0_53 = arith.constant 0 : index
    %c0_54 = arith.constant 0 : index
    %63 = vector.load %arg3[%c0_52, %c3, %c0_53, %c0_54] : memref<1x16x8x9xbf16, #tpu.memory_space<vmem>>, vector<1x1x8x9xbf16>
    %64 = vector.shape_cast %63 : vector<1x1x8x9xbf16> to vector<8x9xbf16>
    %c1_55 = arith.constant 1 : index
    %c0_56 = arith.constant 0 : index
    %c0_57 = arith.constant 0 : index
    %65 = vector.load %arg2[%c1_55, %c0_56, %c0_57] : memref<3x4x12xbf16, #tpu.memory_space<vmem>>, vector<1x4x8xbf16>
    %66 = vector.shape_cast %65 : vector<1x4x8xbf16> to vector<4x8xbf16>
    %c1_58 = arith.constant 1 : index
    %c0_59 = arith.constant 0 : index
    %c8_60 = arith.constant 8 : index
    %67 = vector.load %arg2[%c1_58, %c0_59, %c8_60] : memref<3x4x12xbf16, #tpu.memory_space<vmem>>, vector<1x4x4xbf16>
    %68 = vector.shape_cast %67 : vector<1x4x4xbf16> to vector<4x4xbf16>
    %69 = vector.extract_strided_slice %64 {offsets = [0, 0], sizes = [8, 8], strides = [1, 1]} : vector<8x9xbf16> to vector<8x8xbf16>
    %cst_61 = arith.constant dense<0.000000e+00> : vector<4x8xf32>
    %70 = tpu.matmul %66, %69, %cst_61 {dimension_numbers = #tpu.dot_dimension_numbers<[1], [0], [0], [1], [0, 0, 1, 1], [], []>} : vector<4x8xbf16>, vector<8x8xbf16>, vector<4x8xf32> -> vector<4x8xf32>
    %71 = arith.addf %62, %70 : vector<4x8xf32>
    %72 = vector.extract_strided_slice %64 {offsets = [0, 1], sizes = [4, 8], strides = [1, 1]} : vector<8x9xbf16> to vector<4x8xbf16>
    %cst_62 = arith.constant dense<0.000000e+00> : vector<4x8xf32>
    %73 = tpu.matmul %68, %72, %cst_62 {dimension_numbers = #tpu.dot_dimension_numbers<[1], [0], [0], [1], [0, 0, 1, 1], [], []>} : vector<4x4xbf16>, vector<4x8xbf16>, vector<4x8xf32> -> vector<4x8xf32>
    %74 = arith.addf %71, %73 : vector<4x8xf32>
    %c0_63 = arith.constant 0 : index
    %c4 = arith.constant 4 : index
    %c0_64 = arith.constant 0 : index
    %c0_65 = arith.constant 0 : index
    %75 = vector.load %arg3[%c0_63, %c4, %c0_64, %c0_65] : memref<1x16x8x9xbf16, #tpu.memory_space<vmem>>, vector<1x1x8x9xbf16>
    %76 = vector.shape_cast %75 : vector<1x1x8x9xbf16> to vector<8x9xbf16>
    %c2_66 = arith.constant 2 : index
    %c0_67 = arith.constant 0 : index
    %c0_68 = arith.constant 0 : index
    %77 = vector.load %arg2[%c2_66, %c0_67, %c0_68] : memref<3x4x12xbf16, #tpu.memory_space<vmem>>, vector<1x4x8xbf16>
    %78 = vector.shape_cast %77 : vector<1x4x8xbf16> to vector<4x8xbf16>
    %c2_69 = arith.constant 2 : index
    %c0_70 = arith.constant 0 : index
    %c8_71 = arith.constant 8 : index
    %79 = vector.load %arg2[%c2_69, %c0_70, %c8_71] : memref<3x4x12xbf16, #tpu.memory_space<vmem>>, vector<1x4x4xbf16>
    %80 = vector.shape_cast %79 : vector<1x4x4xbf16> to vector<4x4xbf16>
    %81 = vector.extract_strided_slice %76 {offsets = [0, 0], sizes = [8, 8], strides = [1, 1]} : vector<8x9xbf16> to vector<8x8xbf16>
    %cst_72 = arith.constant dense<0.000000e+00> : vector<4x8xf32>
    %82 = tpu.matmul %78, %81, %cst_72 {dimension_numbers = #tpu.dot_dimension_numbers<[1], [0], [0], [1], [0, 0, 1, 1], [], []>} : vector<4x8xbf16>, vector<8x8xbf16>, vector<4x8xf32> -> vector<4x8xf32>
    %83 = arith.addf %74, %82 : vector<4x8xf32>
    %84 = vector.extract_strided_slice %76 {offsets = [0, 1], sizes = [4, 8], strides = [1, 1]} : vector<8x9xbf16> to vector<4x8xbf16>
    %cst_73 = arith.constant dense<0.000000e+00> : vector<4x8xf32>
    %85 = tpu.matmul %80, %84, %cst_73 {dimension_numbers = #tpu.dot_dimension_numbers<[1], [0], [0], [1], [0, 0, 1, 1], [], []>} : vector<4x4xbf16>, vector<4x8xbf16>, vector<4x8xf32> -> vector<4x8xf32>
    %86 = arith.addf %83, %85 : vector<4x8xf32>
    %87 = arith.truncf %86 : vector<4x8xf32> to vector<4x8xbf16>
    %c0_74 = arith.constant 0 : index
    %c0_75 = arith.constant 0 : index
    %c8_76 = arith.constant 8 : index
    %88 = vector.load %arg5[%c0_74, %c0_75, %c8_76] : memref<1x4x64xbf16, #tpu.memory_space<vmem>>, vector<1x4x8xbf16>
    %89 = vector.shape_cast %88 : vector<1x4x8xbf16> to vector<4x8xbf16>
    %90 = vector.shape_cast %87 : vector<4x8xbf16> to vector<1x4x8xbf16>
    tpu.vector_store %arg5[%c0_74, %c0_75, %c8_76], %90 {strides = array<i32>} : memref<1x4x64xbf16, #tpu.memory_space<vmem>>, vector<1x4x8xbf16>,
    %cst_77 = arith.constant dense<0.000000e+00> : vector<4xf32>
    %91 = vector.multi_reduction <add>, %86, %cst_77 [1] : vector<4x8xf32> to vector<4xf32>
    %92 = vector.shape_cast %91 : vector<4xf32> to vector<4x1xf32>
    %93 = arith.addf %45, %92 : vector<4x1xf32>
    %94 = arith.mulf %86, %86 : vector<4x8xf32>
    %cst_78 = arith.constant dense<0.000000e+00> : vector<4xf32>
    %95 = vector.multi_reduction <add>, %94, %cst_78 [1] : vector<4x8xf32> to vector<4xf32>
    %96 = vector.shape_cast %95 : vector<4xf32> to vector<4x1xf32>
    %97 = arith.addf %49, %96 : vector<4x1xf32>
    %cst_79 = arith.constant 0.000000e+00 : f32
    %98 = vector.broadcast %cst_79 : f32 to vector<4x8xf32>
    %c0_80 = arith.constant 0 : index
    %c4_81 = arith.constant 4 : index
    %c0_82 = arith.constant 0 : index
    %c0_83 = arith.constant 0 : index
    %99 = vector.load %arg3[%c0_80, %c4_81, %c0_82, %c0_83] : memref<1x16x8x9xbf16, #tpu.memory_space<vmem>>, vector<1x1x8x9xbf16>
    %100 = vector.shape_cast %99 : vector<1x1x8x9xbf16> to vector<8x9xbf16>
    %c0_84 = arith.constant 0 : index
    %c0_85 = arith.constant 0 : index
    %c0_86 = arith.constant 0 : index
    %101 = vector.load %arg2[%c0_84, %c0_85, %c0_86] : memref<3x4x12xbf16, #tpu.memory_space<vmem>>, vector<1x4x8xbf16>
    %102 = vector.shape_cast %101 : vector<1x4x8xbf16> to vector<4x8xbf16>
    %c0_87 = arith.constant 0 : index
    %c0_88 = arith.constant 0 : index
    %c8_89 = arith.constant 8 : index
    %103 = vector.load %arg2[%c0_87, %c0_88, %c8_89] : memref<3x4x12xbf16, #tpu.memory_space<vmem>>, vector<1x4x4xbf16>
    %104 = vector.shape_cast %103 : vector<1x4x4xbf16> to vector<4x4xbf16>
    %105 = vector.extract_strided_slice %100 {offsets = [0, 0], sizes = [8, 8], strides = [1, 1]} : vector<8x9xbf16> to vector<8x8xbf16>
    %cst_90 = arith.constant dense<0.000000e+00> : vector<4x8xf32>
    %106 = tpu.matmul %102, %105, %cst_90 {dimension_numbers = #tpu.dot_dimension_numbers<[1], [0], [0], [1], [0, 0, 1, 1], [], []>} : vector<4x8xbf16>, vector<8x8xbf16>, vector<4x8xf32> -> vector<4x8xf32>
    %107 = arith.addf %98, %106 : vector<4x8xf32>
    %108 = vector.extract_strided_slice %100 {offsets = [0, 1], sizes = [4, 8], strides = [1, 1]} : vector<8x9xbf16> to vector<4x8xbf16>
    %cst_91 = arith.constant dense<0.000000e+00> : vector<4x8xf32>
    %109 = tpu.matmul %104, %108, %cst_91 {dimension_numbers = #tpu.dot_dimension_numbers<[1], [0], [0], [1], [0, 0, 1, 1], [], []>} : vector<4x4xbf16>, vector<4x8xbf16>, vector<4x8xf32> -> vector<4x8xf32>
    %110 = arith.addf %107, %109 : vector<4x8xf32>
    %c0_92 = arith.constant 0 : index
    %c5 = arith.constant 5 : index
    %c0_93 = arith.constant 0 : index
    %c0_94 = arith.constant 0 : index
    %111 = vector.load %arg3[%c0_92, %c5, %c0_93, %c0_94] : memref<1x16x8x9xbf16, #tpu.memory_space<vmem>>, vector<1x1x8x9xbf16>
    %112 = vector.shape_cast %111 : vector<1x1x8x9xbf16> to vector<8x9xbf16>
    %c1_95 = arith.constant 1 : index
    %c0_96 = arith.constant 0 : index
    %c0_97 = arith.constant 0 : index
    %113 = vector.load %arg2[%c1_95, %c0_96, %c0_97] : memref<3x4x12xbf16, #tpu.memory_space<vmem>>, vector<1x4x8xbf16>
    %114 = vector.shape_cast %113 : vector<1x4x8xbf16> to vector<4x8xbf16>
    %c1_98 = arith.constant 1 : index
    %c0_99 = arith.constant 0 : index
    %c8_100 = arith.constant 8 : index
    %115 = vector.load %arg2[%c1_98, %c0_99, %c8_100] : memref<3x4x12xbf16, #tpu.memory_space<vmem>>, vector<1x4x4xbf16>
    %116 = vector.shape_cast %115 : vector<1x4x4xbf16> to vector<4x4xbf16>
    %117 = vector.extract_strided_slice %112 {offsets = [0, 0], sizes = [8, 8], strides = [1, 1]} : vector<8x9xbf16> to vector<8x8xbf16>
    %cst_101 = arith.constant dense<0.000000e+00> : vector<4x8xf32>
    %118 = tpu.matmul %114, %117, %cst_101 {dimension_numbers = #tpu.dot_dimension_numbers<[1], [0], [0], [1], [0, 0, 1, 1], [], []>} : vector<4x8xbf16>, vector<8x8xbf16>, vector<4x8xf32> -> vector<4x8xf32>
    %119 = arith.addf %110, %118 : vector<4x8xf32>
    %120 = vector.extract_strided_slice %112 {offsets = [0, 1], sizes = [4, 8], strides = [1, 1]} : vector<8x9xbf16> to vector<4x8xbf16>
    %cst_102 = arith.constant dense<0.000000e+00> : vector<4x8xf32>
    %121 = tpu.matmul %116, %120, %cst_102 {dimension_numbers = #tpu.dot_dimension_numbers<[1], [0], [0], [1], [0, 0, 1, 1], [], []>} : vector<4x4xbf16>, vector<4x8xbf16>, vector<4x8xf32> -> vector<4x8xf32>
    %122 = arith.addf %119, %121 : vector<4x8xf32>
    %c0_103 = arith.constant 0 : index
    %c6 = arith.constant 6 : index
    %c0_104 = arith.constant 0 : index
    %c0_105 = arith.constant 0 : index
    %123 = vector.load %arg3[%c0_103, %c6, %c0_104, %c0_105] : memref<1x16x8x9xbf16, #tpu.memory_space<vmem>>, vector<1x1x8x9xbf16>
    %124 = vector.shape_cast %123 : vector<1x1x8x9xbf16> to vector<8x9xbf16>
    %c2_106 = arith.constant 2 : index
    %c0_107 = arith.constant 0 : index
    %c0_108 = arith.constant 0 : index
    %125 = vector.load %arg2[%c2_106, %c0_107, %c0_108] : memref<3x4x12xbf16, #tpu.memory_space<vmem>>, vector<1x4x8xbf16>
    %126 = vector.shape_cast %125 : vector<1x4x8xbf16> to vector<4x8xbf16>
    %c2_109 = arith.constant 2 : index
    %c0_110 = arith.constant 0 : index
    %c8_111 = arith.constant 8 : index
    %127 = vector.load %arg2[%c2_109, %c0_110, %c8_111] : memref<3x4x12xbf16, #tpu.memory_space<vmem>>, vector<1x4x4xbf16>
    %128 = vector.shape_cast %127 : vector<1x4x4xbf16> to vector<4x4xbf16>
    %129 = vector.extract_strided_slice %124 {offsets = [0, 0], sizes = [8, 8], strides = [1, 1]} : vector<8x9xbf16> to vector<8x8xbf16>
    %cst_112 = arith.constant dense<0.000000e+00> : vector<4x8xf32>
    %130 = tpu.matmul %126, %129, %cst_112 {dimension_numbers = #tpu.dot_dimension_numbers<[1], [0], [0], [1], [0, 0, 1, 1], [], []>} : vector<4x8xbf16>, vector<8x8xbf16>, vector<4x8xf32> -> vector<4x8xf32>
    %131 = arith.addf %122, %130 : vector<4x8xf32>
    %132 = vector.extract_strided_slice %124 {offsets = [0, 1], sizes = [4, 8], strides = [1, 1]} : vector<8x9xbf16> to vector<4x8xbf16>
    %cst_113 = arith.constant dense<0.000000e+00> : vector<4x8xf32>
    %133 = tpu.matmul %128, %132, %cst_113 {dimension_numbers = #tpu.dot_dimension_numbers<[1], [0], [0], [1], [0, 0, 1, 1], [], []>} : vector<4x4xbf16>, vector<4x8xbf16>, vector<4x8xf32> -> vector<4x8xf32>
    %134 = arith.addf %131, %133 : vector<4x8xf32>
    %135 = arith.truncf %134 : vector<4x8xf32> to vector<4x8xbf16>
    %c0_114 = arith.constant 0 : index
    %c0_115 = arith.constant 0 : index
    %c16 = arith.constant 16 : index
    %136 = vector.load %arg5[%c0_114, %c0_115, %c16] : memref<1x4x64xbf16, #tpu.memory_space<vmem>>, vector<1x4x8xbf16>
    %137 = vector.shape_cast %136 : vector<1x4x8xbf16> to vector<4x8xbf16>
    %138 = vector.shape_cast %135 : vector<4x8xbf16> to vector<1x4x8xbf16>
    tpu.vector_store %arg5[%c0_114, %c0_115, %c16], %138 {strides = array<i32>} : memref<1x4x64xbf16, #tpu.memory_space<vmem>>, vector<1x4x8xbf16>,
    %cst_116 = arith.constant dense<0.000000e+00> : vector<4xf32>
    %139 = vector.multi_reduction <add>, %134, %cst_116 [1] : vector<4x8xf32> to vector<4xf32>
    %140 = vector.shape_cast %139 : vector<4xf32> to vector<4x1xf32>
    %141 = arith.addf %93, %140 : vector<4x1xf32>
    %142 = arith.mulf %134, %134 : vector<4x8xf32>
    %cst_117 = arith.constant dense<0.000000e+00> : vector<4xf32>
    %143 = vector.multi_reduction <add>, %142, %cst_117 [1] : vector<4x8xf32> to vector<4xf32>
    %144 = vector.shape_cast %143 : vector<4xf32> to vector<4x1xf32>
    %145 = arith.addf %97, %144 : vector<4x1xf32>
    %cst_118 = arith.constant 0.000000e+00 : f32
    %146 = vector.broadcast %cst_118 : f32 to vector<4x8xf32>
    %c0_119 = arith.constant 0 : index
    %c6_120 = arith.constant 6 : index
    %c0_121 = arith.constant 0 : index
    %c0_122 = arith.constant 0 : index
    %147 = vector.load %arg3[%c0_119, %c6_120, %c0_121, %c0_122] : memref<1x16x8x9xbf16, #tpu.memory_space<vmem>>, vector<1x1x8x9xbf16>
    %148 = vector.shape_cast %147 : vector<1x1x8x9xbf16> to vector<8x9xbf16>
    %c0_123 = arith.constant 0 : index
    %c0_124 = arith.constant 0 : index
    %c0_125 = arith.constant 0 : index
    %149 = vector.load %arg2[%c0_123, %c0_124, %c0_125] : memref<3x4x12xbf16, #tpu.memory_space<vmem>>, vector<1x4x8xbf16>
    %150 = vector.shape_cast %149 : vector<1x4x8xbf16> to vector<4x8xbf16>
    %c0_126 = arith.constant 0 : index
    %c0_127 = arith.constant 0 : index
    %c8_128 = arith.constant 8 : index
    %151 = vector.load %arg2[%c0_126, %c0_127, %c8_128] : memref<3x4x12xbf16, #tpu.memory_space<vmem>>, vector<1x4x4xbf16>
    %152 = vector.shape_cast %151 : vector<1x4x4xbf16> to vector<4x4xbf16>
    %153 = vector.extract_strided_slice %148 {offsets = [0, 0], sizes = [8, 8], strides = [1, 1]} : vector<8x9xbf16> to vector<8x8xbf16>
    %cst_129 = arith.constant dense<0.000000e+00> : vector<4x8xf32>
    %154 = tpu.matmul %150, %153, %cst_129 {dimension_numbers = #tpu.dot_dimension_numbers<[1], [0], [0], [1], [0, 0, 1, 1], [], []>} : vector<4x8xbf16>, vector<8x8xbf16>, vector<4x8xf32> -> vector<4x8xf32>
    %155 = arith.addf %146, %154 : vector<4x8xf32>
    %156 = vector.extract_strided_slice %148 {offsets = [0, 1], sizes = [4, 8], strides = [1, 1]} : vector<8x9xbf16> to vector<4x8xbf16>
    %cst_130 = arith.constant dense<0.000000e+00> : vector<4x8xf32>
    %157 = tpu.matmul %152, %156, %cst_130 {dimension_numbers = #tpu.dot_dimension_numbers<[1], [0], [0], [1], [0, 0, 1, 1], [], []>} : vector<4x4xbf16>, vector<4x8xbf16>, vector<4x8xf32> -> vector<4x8xf32>
    %158 = arith.addf %155, %157 : vector<4x8xf32>
    %c0_131 = arith.constant 0 : index
    %c7 = arith.constant 7 : index
    %c0_132 = arith.constant 0 : index
    %c0_133 = arith.constant 0 : index
    %159 = vector.load %arg3[%c0_131, %c7, %c0_132, %c0_133] : memref<1x16x8x9xbf16, #tpu.memory_space<vmem>>, vector<1x1x8x9xbf16>
    %160 = vector.shape_cast %159 : vector<1x1x8x9xbf16> to vector<8x9xbf16>
    %c1_134 = arith.constant 1 : index
    %c0_135 = arith.constant 0 : index
    %c0_136 = arith.constant 0 : index
    %161 = vector.load %arg2[%c1_134, %c0_135, %c0_136] : memref<3x4x12xbf16, #tpu.memory_space<vmem>>, vector<1x4x8xbf16>
    %162 = vector.shape_cast %161 : vector<1x4x8xbf16> to vector<4x8xbf16>
    %c1_137 = arith.constant 1 : index
    %c0_138 = arith.constant 0 : index
    %c8_139 = arith.constant 8 : index
    %163 = vector.load %arg2[%c1_137, %c0_138, %c8_139] : memref<3x4x12xbf16, #tpu.memory_space<vmem>>, vector<1x4x4xbf16>
    %164 = vector.shape_cast %163 : vector<1x4x4xbf16> to vector<4x4xbf16>
    %165 = vector.extract_strided_slice %160 {offsets = [0, 0], sizes = [8, 8], strides = [1, 1]} : vector<8x9xbf16> to vector<8x8xbf16>
    %cst_140 = arith.constant dense<0.000000e+00> : vector<4x8xf32>
    %166 = tpu.matmul %162, %165, %cst_140 {dimension_numbers = #tpu.dot_dimension_numbers<[1], [0], [0], [1], [0, 0, 1, 1], [], []>} : vector<4x8xbf16>, vector<8x8xbf16>, vector<4x8xf32> -> vector<4x8xf32>
    %167 = arith.addf %158, %166 : vector<4x8xf32>
    %168 = vector.extract_strided_slice %160 {offsets = [0, 1], sizes = [4, 8], strides = [1, 1]} : vector<8x9xbf16> to vector<4x8xbf16>
    %cst_141 = arith.constant dense<0.000000e+00> : vector<4x8xf32>
    %169 = tpu.matmul %164, %168, %cst_141 {dimension_numbers = #tpu.dot_dimension_numbers<[1], [0], [0], [1], [0, 0, 1, 1], [], []>} : vector<4x4xbf16>, vector<4x8xbf16>, vector<4x8xf32> -> vector<4x8xf32>
    %170 = arith.addf %167, %169 : vector<4x8xf32>
    %c0_142 = arith.constant 0 : index
    %c8_143 = arith.constant 8 : index
    %c0_144 = arith.constant 0 : index
    %c0_145 = arith.constant 0 : index
    %171 = vector.load %arg3[%c0_142, %c8_143, %c0_144, %c0_145] : memref<1x16x8x9xbf16, #tpu.memory_space<vmem>>, vector<1x1x8x9xbf16>
    %172 = vector.shape_cast %171 : vector<1x1x8x9xbf16> to vector<8x9xbf16>
    %c2_146 = arith.constant 2 : index
    %c0_147 = arith.constant 0 : index
    %c0_148 = arith.constant 0 : index
    %173 = vector.load %arg2[%c2_146, %c0_147, %c0_148] : memref<3x4x12xbf16, #tpu.memory_space<vmem>>, vector<1x4x8xbf16>
    %174 = vector.shape_cast %173 : vector<1x4x8xbf16> to vector<4x8xbf16>
    %c2_149 = arith.constant 2 : index
    %c0_150 = arith.constant 0 : index
    %c8_151 = arith.constant 8 : index
    %175 = vector.load %arg2[%c2_149, %c0_150, %c8_151] : memref<3x4x12xbf16, #tpu.memory_space<vmem>>, vector<1x4x4xbf16>
    %176 = vector.shape_cast %175 : vector<1x4x4xbf16> to vector<4x4xbf16>
    %177 = vector.extract_strided_slice %172 {offsets = [0, 0], sizes = [8, 8], strides = [1, 1]} : vector<8x9xbf16> to vector<8x8xbf16>
    %cst_152 = arith.constant dense<0.000000e+00> : vector<4x8xf32>
    %178 = tpu.matmul %174, %177, %cst_152 {dimension_numbers = #tpu.dot_dimension_numbers<[1], [0], [0], [1], [0, 0, 1, 1], [], []>} : vector<4x8xbf16>, vector<8x8xbf16>, vector<4x8xf32> -> vector<4x8xf32>
    %179 = arith.addf %170, %178 : vector<4x8xf32>
    %180 = vector.extract_strided_slice %172 {offsets = [0, 1], sizes = [4, 8], strides = [1, 1]} : vector<8x9xbf16> to vector<4x8xbf16>
    %cst_153 = arith.constant dense<0.000000e+00> : vector<4x8xf32>
    %181 = tpu.matmul %176, %180, %cst_153 {dimension_numbers = #tpu.dot_dimension_numbers<[1], [0], [0], [1], [0, 0, 1, 1], [], []>} : vector<4x4xbf16>, vector<4x8xbf16>, vector<4x8xf32> -> vector<4x8xf32>
    %182 = arith.addf %179, %181 : vector<4x8xf32>
    %183 = arith.truncf %182 : vector<4x8xf32> to vector<4x8xbf16>
    %c0_154 = arith.constant 0 : index
    %c0_155 = arith.constant 0 : index
    %c24 = arith.constant 24 : index
    %184 = vector.load %arg5[%c0_154, %c0_155, %c24] : memref<1x4x64xbf16, #tpu.memory_space<vmem>>, vector<1x4x8xbf16>
    %185 = vector.shape_cast %184 : vector<1x4x8xbf16> to vector<4x8xbf16>
    %186 = vector.shape_cast %183 : vector<4x8xbf16> to vector<1x4x8xbf16>
    tpu.vector_store %arg5[%c0_154, %c0_155, %c24], %186 {strides = array<i32>} : memref<1x4x64xbf16, #tpu.memory_space<vmem>>, vector<1x4x8xbf16>,
    %cst_156 = arith.constant dense<0.000000e+00> : vector<4xf32>
    %187 = vector.multi_reduction <add>, %182, %cst_156 [1] : vector<4x8xf32> to vector<4xf32>
    %188 = vector.shape_cast %187 : vector<4xf32> to vector<4x1xf32>
    %189 = arith.addf %141, %188 : vector<4x1xf32>
    %190 = arith.mulf %182, %182 : vector<4x8xf32>
    %cst_157 = arith.constant dense<0.000000e+00> : vector<4xf32>
    %191 = vector.multi_reduction <add>, %190, %cst_157 [1] : vector<4x8xf32> to vector<4xf32>
    %192 = vector.shape_cast %191 : vector<4xf32> to vector<4x1xf32>
    %193 = arith.addf %145, %192 : vector<4x1xf32>
    %cst_158 = arith.constant 0.000000e+00 : f32
    %194 = vector.broadcast %cst_158 : f32 to vector<4x8xf32>
    %c0_159 = arith.constant 0 : index
    %c8_160 = arith.constant 8 : index
    %c0_161 = arith.constant 0 : index
    %c0_162 = arith.constant 0 : index
    %195 = vector.load %arg3[%c0_159, %c8_160, %c0_161, %c0_162] : memref<1x16x8x9xbf16, #tpu.memory_space<vmem>>, vector<1x1x8x9xbf16>
    %196 = vector.shape_cast %195 : vector<1x1x8x9xbf16> to vector<8x9xbf16>
    %c0_163 = arith.constant 0 : index
    %c0_164 = arith.constant 0 : index
    %c0_165 = arith.constant 0 : index
    %197 = vector.load %arg2[%c0_163, %c0_164, %c0_165] : memref<3x4x12xbf16, #tpu.memory_space<vmem>>, vector<1x4x8xbf16>
    %198 = vector.shape_cast %197 : vector<1x4x8xbf16> to vector<4x8xbf16>
    %c0_166 = arith.constant 0 : index
    %c0_167 = arith.constant 0 : index
    %c8_168 = arith.constant 8 : index
    %199 = vector.load %arg2[%c0_166, %c0_167, %c8_168] : memref<3x4x12xbf16, #tpu.memory_space<vmem>>, vector<1x4x4xbf16>
    %200 = vector.shape_cast %199 : vector<1x4x4xbf16> to vector<4x4xbf16>
    %201 = vector.extract_strided_slice %196 {offsets = [0, 0], sizes = [8, 8], strides = [1, 1]} : vector<8x9xbf16> to vector<8x8xbf16>
    %cst_169 = arith.constant dense<0.000000e+00> : vector<4x8xf32>
    %202 = tpu.matmul %198, %201, %cst_169 {dimension_numbers = #tpu.dot_dimension_numbers<[1], [0], [0], [1], [0, 0, 1, 1], [], []>} : vector<4x8xbf16>, vector<8x8xbf16>, vector<4x8xf32> -> vector<4x8xf32>
    %203 = arith.addf %194, %202 : vector<4x8xf32>
    %204 = vector.extract_strided_slice %196 {offsets = [0, 1], sizes = [4, 8], strides = [1, 1]} : vector<8x9xbf16> to vector<4x8xbf16>
    %cst_170 = arith.constant dense<0.000000e+00> : vector<4x8xf32>
    %205 = tpu.matmul %200, %204, %cst_170 {dimension_numbers = #tpu.dot_dimension_numbers<[1], [0], [0], [1], [0, 0, 1, 1], [], []>} : vector<4x4xbf16>, vector<4x8xbf16>, vector<4x8xf32> -> vector<4x8xf32>
    %206 = arith.addf %203, %205 : vector<4x8xf32>
    %c0_171 = arith.constant 0 : index
    %c9 = arith.constant 9 : index
    %c0_172 = arith.constant 0 : index
    %c0_173 = arith.constant 0 : index
    %207 = vector.load %arg3[%c0_171, %c9, %c0_172, %c0_173] : memref<1x16x8x9xbf16, #tpu.memory_space<vmem>>, vector<1x1x8x9xbf16>
    %208 = vector.shape_cast %207 : vector<1x1x8x9xbf16> to vector<8x9xbf16>
    %c1_174 = arith.constant 1 : index
    %c0_175 = arith.constant 0 : index
    %c0_176 = arith.constant 0 : index
    %209 = vector.load %arg2[%c1_174, %c0_175, %c0_176] : memref<3x4x12xbf16, #tpu.memory_space<vmem>>, vector<1x4x8xbf16>
    %210 = vector.shape_cast %209 : vector<1x4x8xbf16> to vector<4x8xbf16>
    %c1_177 = arith.constant 1 : index
    %c0_178 = arith.constant 0 : index
    %c8_179 = arith.constant 8 : index
    %211 = vector.load %arg2[%c1_177, %c0_178, %c8_179] : memref<3x4x12xbf16, #tpu.memory_space<vmem>>, vector<1x4x4xbf16>
    %212 = vector.shape_cast %211 : vector<1x4x4xbf16> to vector<4x4xbf16>
    %213 = vector.extract_strided_slice %208 {offsets = [0, 0], sizes = [8, 8], strides = [1, 1]} : vector<8x9xbf16> to vector<8x8xbf16>
    %cst_180 = arith.constant dense<0.000000e+00> : vector<4x8xf32>
    %214 = tpu.matmul %210, %213, %cst_180 {dimension_numbers = #tpu.dot_dimension_numbers<[1], [0], [0], [1], [0, 0, 1, 1], [], []>} : vector<4x8xbf16>, vector<8x8xbf16>, vector<4x8xf32> -> vector<4x8xf32>
    %215 = arith.addf %206, %214 : vector<4x8xf32>
    %216 = vector.extract_strided_slice %208 {offsets = [0, 1], sizes = [4, 8], strides = [1, 1]} : vector<8x9xbf16> to vector<4x8xbf16>
    %cst_181 = arith.constant dense<0.000000e+00> : vector<4x8xf32>
    %217 = tpu.matmul %212, %216, %cst_181 {dimension_numbers = #tpu.dot_dimension_numbers<[1], [0], [0], [1], [0, 0, 1, 1], [], []>} : vector<4x4xbf16>, vector<4x8xbf16>, vector<4x8xf32> -> vector<4x8xf32>
    %218 = arith.addf %215, %217 : vector<4x8xf32>
    %c0_182 = arith.constant 0 : index
    %c10 = arith.constant 10 : index
    %c0_183 = arith.constant 0 : index
    %c0_184 = arith.constant 0 : index
    %219 = vector.load %arg3[%c0_182, %c10, %c0_183, %c0_184] : memref<1x16x8x9xbf16, #tpu.memory_space<vmem>>, vector<1x1x8x9xbf16>
    %220 = vector.shape_cast %219 : vector<1x1x8x9xbf16> to vector<8x9xbf16>
    %c2_185 = arith.constant 2 : index
    %c0_186 = arith.constant 0 : index
    %c0_187 = arith.constant 0 : index
    %221 = vector.load %arg2[%c2_185, %c0_186, %c0_187] : memref<3x4x12xbf16, #tpu.memory_space<vmem>>, vector<1x4x8xbf16>
    %222 = vector.shape_cast %221 : vector<1x4x8xbf16> to vector<4x8xbf16>
    %c2_188 = arith.constant 2 : index
    %c0_189 = arith.constant 0 : index
    %c8_190 = arith.constant 8 : index
    %223 = vector.load %arg2[%c2_188, %c0_189, %c8_190] : memref<3x4x12xbf16, #tpu.memory_space<vmem>>, vector<1x4x4xbf16>
    %224 = vector.shape_cast %223 : vector<1x4x4xbf16> to vector<4x4xbf16>
    %225 = vector.extract_strided_slice %220 {offsets = [0, 0], sizes = [8, 8], strides = [1, 1]} : vector<8x9xbf16> to vector<8x8xbf16>
    %cst_191 = arith.constant dense<0.000000e+00> : vector<4x8xf32>
    %226 = tpu.matmul %222, %225, %cst_191 {dimension_numbers = #tpu.dot_dimension_numbers<[1], [0], [0], [1], [0, 0, 1, 1], [], []>} : vector<4x8xbf16>, vector<8x8xbf16>, vector<4x8xf32> -> vector<4x8xf32>
    %227 = arith.addf %218, %226 : vector<4x8xf32>
    %228 = vector.extract_strided_slice %220 {offsets = [0, 1], sizes = [4, 8], strides = [1, 1]} : vector<8x9xbf16> to vector<4x8xbf16>
    %cst_192 = arith.constant dense<0.000000e+00> : vector<4x8xf32>
    %229 = tpu.matmul %224, %228, %cst_192 {dimension_numbers = #tpu.dot_dimension_numbers<[1], [0], [0], [1], [0, 0, 1, 1], [], []>} : vector<4x4xbf16>, vector<4x8xbf16>, vector<4x8xf32> -> vector<4x8xf32>
    %230 = arith.addf %227, %229 : vector<4x8xf32>
    %231 = arith.truncf %230 : vector<4x8xf32> to vector<4x8xbf16>
    %c0_193 = arith.constant 0 : index
    %c0_194 = arith.constant 0 : index
    %c32 = arith.constant 32 : index
    %232 = vector.load %arg5[%c0_193, %c0_194, %c32] : memref<1x4x64xbf16, #tpu.memory_space<vmem>>, vector<1x4x8xbf16>
    %233 = vector.shape_cast %232 : vector<1x4x8xbf16> to vector<4x8xbf16>
    %234 = vector.shape_cast %231 : vector<4x8xbf16> to vector<1x4x8xbf16>
    tpu.vector_store %arg5[%c0_193, %c0_194, %c32], %234 {strides = array<i32>} : memref<1x4x64xbf16, #tpu.memory_space<vmem>>, vector<1x4x8xbf16>,
    %cst_195 = arith.constant dense<0.000000e+00> : vector<4xf32>
    %235 = vector.multi_reduction <add>, %230, %cst_195 [1] : vector<4x8xf32> to vector<4xf32>
    %236 = vector.shape_cast %235 : vector<4xf32> to vector<4x1xf32>
    %237 = arith.addf %189, %236 : vector<4x1xf32>
    %238 = arith.mulf %230, %230 : vector<4x8xf32>
    %cst_196 = arith.constant dense<0.000000e+00> : vector<4xf32>
    %239 = vector.multi_reduction <add>, %238, %cst_196 [1] : vector<4x8xf32> to vector<4xf32>
    %240 = vector.shape_cast %239 : vector<4xf32> to vector<4x1xf32>
    %241 = arith.addf %193, %240 : vector<4x1xf32>
    %cst_197 = arith.constant 0.000000e+00 : f32
    %242 = vector.broadcast %cst_197 : f32 to vector<4x8xf32>
    %c0_198 = arith.constant 0 : index
    %c10_199 = arith.constant 10 : index
    %c0_200 = arith.constant 0 : index
    %c0_201 = arith.constant 0 : index
    %243 = vector.load %arg3[%c0_198, %c10_199, %c0_200, %c0_201] : memref<1x16x8x9xbf16, #tpu.memory_space<vmem>>, vector<1x1x8x9xbf16>
    %244 = vector.shape_cast %243 : vector<1x1x8x9xbf16> to vector<8x9xbf16>
    %c0_202 = arith.constant 0 : index
    %c0_203 = arith.constant 0 : index
    %c0_204 = arith.constant 0 : index
    %245 = vector.load %arg2[%c0_202, %c0_203, %c0_204] : memref<3x4x12xbf16, #tpu.memory_space<vmem>>, vector<1x4x8xbf16>
    %246 = vector.shape_cast %245 : vector<1x4x8xbf16> to vector<4x8xbf16>
    %c0_205 = arith.constant 0 : index
    %c0_206 = arith.constant 0 : index
    %c8_207 = arith.constant 8 : index
    %247 = vector.load %arg2[%c0_205, %c0_206, %c8_207] : memref<3x4x12xbf16, #tpu.memory_space<vmem>>, vector<1x4x4xbf16>
    %248 = vector.shape_cast %247 : vector<1x4x4xbf16> to vector<4x4xbf16>
    %249 = vector.extract_strided_slice %244 {offsets = [0, 0], sizes = [8, 8], strides = [1, 1]} : vector<8x9xbf16> to vector<8x8xbf16>
    %cst_208 = arith.constant dense<0.000000e+00> : vector<4x8xf32>
    %250 = tpu.matmul %246, %249, %cst_208 {dimension_numbers = #tpu.dot_dimension_numbers<[1], [0], [0], [1], [0, 0, 1, 1], [], []>} : vector<4x8xbf16>, vector<8x8xbf16>, vector<4x8xf32> -> vector<4x8xf32>
    %251 = arith.addf %242, %250 : vector<4x8xf32>
    %252 = vector.extract_strided_slice %244 {offsets = [0, 1], sizes = [4, 8], strides = [1, 1]} : vector<8x9xbf16> to vector<4x8xbf16>
    %cst_209 = arith.constant dense<0.000000e+00> : vector<4x8xf32>
    %253 = tpu.matmul %248, %252, %cst_209 {dimension_numbers = #tpu.dot_dimension_numbers<[1], [0], [0], [1], [0, 0, 1, 1], [], []>} : vector<4x4xbf16>, vector<4x8xbf16>, vector<4x8xf32> -> vector<4x8xf32>
    %254 = arith.addf %251, %253 : vector<4x8xf32>
    %c0_210 = arith.constant 0 : index
    %c11 = arith.constant 11 : index
    %c0_211 = arith.constant 0 : index
    %c0_212 = arith.constant 0 : index
    %255 = vector.load %arg3[%c0_210, %c11, %c0_211, %c0_212] : memref<1x16x8x9xbf16, #tpu.memory_space<vmem>>, vector<1x1x8x9xbf16>
    %256 = vector.shape_cast %255 : vector<1x1x8x9xbf16> to vector<8x9xbf16>
    %c1_213 = arith.constant 1 : index
    %c0_214 = arith.constant 0 : index
    %c0_215 = arith.constant 0 : index
    %257 = vector.load %arg2[%c1_213, %c0_214, %c0_215] : memref<3x4x12xbf16, #tpu.memory_space<vmem>>, vector<1x4x8xbf16>
    %258 = vector.shape_cast %257 : vector<1x4x8xbf16> to vector<4x8xbf16>
    %c1_216 = arith.constant 1 : index
    %c0_217 = arith.constant 0 : index
    %c8_218 = arith.constant 8 : index
    %259 = vector.load %arg2[%c1_216, %c0_217, %c8_218] : memref<3x4x12xbf16, #tpu.memory_space<vmem>>, vector<1x4x4xbf16>
    %260 = vector.shape_cast %259 : vector<1x4x4xbf16> to vector<4x4xbf16>
    %261 = vector.extract_strided_slice %256 {offsets = [0, 0], sizes = [8, 8], strides = [1, 1]} : vector<8x9xbf16> to vector<8x8xbf16>
    %cst_219 = arith.constant dense<0.000000e+00> : vector<4x8xf32>
    %262 = tpu.matmul %258, %261, %cst_219 {dimension_numbers = #tpu.dot_dimension_numbers<[1], [0], [0], [1], [0, 0, 1, 1], [], []>} : vector<4x8xbf16>, vector<8x8xbf16>, vector<4x8xf32> -> vector<4x8xf32>
    %263 = arith.addf %254, %262 : vector<4x8xf32>
    %264 = vector.extract_strided_slice %256 {offsets = [0, 1], sizes = [4, 8], strides = [1, 1]} : vector<8x9xbf16> to vector<4x8xbf16>
    %cst_220 = arith.constant dense<0.000000e+00> : vector<4x8xf32>
    %265 = tpu.matmul %260, %264, %cst_220 {dimension_numbers = #tpu.dot_dimension_numbers<[1], [0], [0], [1], [0, 0, 1, 1], [], []>} : vector<4x4xbf16>, vector<4x8xbf16>, vector<4x8xf32> -> vector<4x8xf32>
    %266 = arith.addf %263, %265 : vector<4x8xf32>
    %c0_221 = arith.constant 0 : index
    %c12 = arith.constant 12 : index
    %c0_222 = arith.constant 0 : index
    %c0_223 = arith.constant 0 : index
    %267 = vector.load %arg3[%c0_221, %c12, %c0_222, %c0_223] : memref<1x16x8x9xbf16, #tpu.memory_space<vmem>>, vector<1x1x8x9xbf16>
    %268 = vector.shape_cast %267 : vector<1x1x8x9xbf16> to vector<8x9xbf16>
    %c2_224 = arith.constant 2 : index
    %c0_225 = arith.constant 0 : index
    %c0_226 = arith.constant 0 : index
    %269 = vector.load %arg2[%c2_224, %c0_225, %c0_226] : memref<3x4x12xbf16, #tpu.memory_space<vmem>>, vector<1x4x8xbf16>
    %270 = vector.shape_cast %269 : vector<1x4x8xbf16> to vector<4x8xbf16>
    %c2_227 = arith.constant 2 : index
    %c0_228 = arith.constant 0 : index
    %c8_229 = arith.constant 8 : index
    %271 = vector.load %arg2[%c2_227, %c0_228, %c8_229] : memref<3x4x12xbf16, #tpu.memory_space<vmem>>, vector<1x4x4xbf16>
    %272 = vector.shape_cast %271 : vector<1x4x4xbf16> to vector<4x4xbf16>
    %273 = vector.extract_strided_slice %268 {offsets = [0, 0], sizes = [8, 8], strides = [1, 1]} : vector<8x9xbf16> to vector<8x8xbf16>
    %cst_230 = arith.constant dense<0.000000e+00> : vector<4x8xf32>
    %274 = tpu.matmul %270, %273, %cst_230 {dimension_numbers = #tpu.dot_dimension_numbers<[1], [0], [0], [1], [0, 0, 1, 1], [], []>} : vector<4x8xbf16>, vector<8x8xbf16>, vector<4x8xf32> -> vector<4x8xf32>
    %275 = arith.addf %266, %274 : vector<4x8xf32>
    %276 = vector.extract_strided_slice %268 {offsets = [0, 1], sizes = [4, 8], strides = [1, 1]} : vector<8x9xbf16> to vector<4x8xbf16>
    %cst_231 = arith.constant dense<0.000000e+00> : vector<4x8xf32>
    %277 = tpu.matmul %272, %276, %cst_231 {dimension_numbers = #tpu.dot_dimension_numbers<[1], [0], [0], [1], [0, 0, 1, 1], [], []>} : vector<4x4xbf16>, vector<4x8xbf16>, vector<4x8xf32> -> vector<4x8xf32>
    %278 = arith.addf %275, %277 : vector<4x8xf32>
    %279 = arith.truncf %278 : vector<4x8xf32> to vector<4x8xbf16>
    %c0_232 = arith.constant 0 : index
    %c0_233 = arith.constant 0 : index
    %c40 = arith.constant 40 : index
    %280 = vector.load %arg5[%c0_232, %c0_233, %c40] : memref<1x4x64xbf16, #tpu.memory_space<vmem>>, vector<1x4x8xbf16>
    %281 = vector.shape_cast %280 : vector<1x4x8xbf16> to vector<4x8xbf16>
    %282 = vector.shape_cast %279 : vector<4x8xbf16> to vector<1x4x8xbf16>
    tpu.vector_store %arg5[%c0_232, %c0_233, %c40], %282 {strides = array<i32>} : memref<1x4x64xbf16, #tpu.memory_space<vmem>>, vector<1x4x8xbf16>,
    %cst_234 = arith.constant dense<0.000000e+00> : vector<4xf32>
    %283 = vector.multi_reduction <add>, %278, %cst_234 [1] : vector<4x8xf32> to vector<4xf32>
    %284 = vector.shape_cast %283 : vector<4xf32> to vector<4x1xf32>
    %285 = arith.addf %237, %284 : vector<4x1xf32>
    %286 = arith.mulf %278, %278 : vector<4x8xf32>
    %cst_235 = arith.constant dense<0.000000e+00> : vector<4xf32>
    %287 = vector.multi_reduction <add>, %286, %cst_235 [1] : vector<4x8xf32> to vector<4xf32>
    %288 = vector.shape_cast %287 : vector<4xf32> to vector<4x1xf32>
    %289 = arith.addf %241, %288 : vector<4x1xf32>
    %cst_236 = arith.constant 0.000000e+00 : f32
    %290 = vector.broadcast %cst_236 : f32 to vector<4x8xf32>
    %c0_237 = arith.constant 0 : index
    %c12_238 = arith.constant 12 : index
    %c0_239 = arith.constant 0 : index
    %c0_240 = arith.constant 0 : index
    %291 = vector.load %arg3[%c0_237, %c12_238, %c0_239, %c0_240] : memref<1x16x8x9xbf16, #tpu.memory_space<vmem>>, vector<1x1x8x9xbf16>
    %292 = vector.shape_cast %291 : vector<1x1x8x9xbf16> to vector<8x9xbf16>
    %c0_241 = arith.constant 0 : index
    %c0_242 = arith.constant 0 : index
    %c0_243 = arith.constant 0 : index
    %293 = vector.load %arg2[%c0_241, %c0_242, %c0_243] : memref<3x4x12xbf16, #tpu.memory_space<vmem>>, vector<1x4x8xbf16>
    %294 = vector.shape_cast %293 : vector<1x4x8xbf16> to vector<4x8xbf16>
    %c0_244 = arith.constant 0 : index
    %c0_245 = arith.constant 0 : index
    %c8_246 = arith.constant 8 : index
    %295 = vector.load %arg2[%c0_244, %c0_245, %c8_246] : memref<3x4x12xbf16, #tpu.memory_space<vmem>>, vector<1x4x4xbf16>
    %296 = vector.shape_cast %295 : vector<1x4x4xbf16> to vector<4x4xbf16>
    %297 = vector.extract_strided_slice %292 {offsets = [0, 0], sizes = [8, 8], strides = [1, 1]} : vector<8x9xbf16> to vector<8x8xbf16>
    %cst_247 = arith.constant dense<0.000000e+00> : vector<4x8xf32>
    %298 = tpu.matmul %294, %297, %cst_247 {dimension_numbers = #tpu.dot_dimension_numbers<[1], [0], [0], [1], [0, 0, 1, 1], [], []>} : vector<4x8xbf16>, vector<8x8xbf16>, vector<4x8xf32> -> vector<4x8xf32>
    %299 = arith.addf %290, %298 : vector<4x8xf32>
    %300 = vector.extract_strided_slice %292 {offsets = [0, 1], sizes = [4, 8], strides = [1, 1]} : vector<8x9xbf16> to vector<4x8xbf16>
    %cst_248 = arith.constant dense<0.000000e+00> : vector<4x8xf32>
    %301 = tpu.matmul %296, %300, %cst_248 {dimension_numbers = #tpu.dot_dimension_numbers<[1], [0], [0], [1], [0, 0, 1, 1], [], []>} : vector<4x4xbf16>, vector<4x8xbf16>, vector<4x8xf32> -> vector<4x8xf32>
    %302 = arith.addf %299, %301 : vector<4x8xf32>
    %c0_249 = arith.constant 0 : index
    %c13 = arith.constant 13 : index
    %c0_250 = arith.constant 0 : index
    %c0_251 = arith.constant 0 : index
    %303 = vector.load %arg3[%c0_249, %c13, %c0_250, %c0_251] : memref<1x16x8x9xbf16, #tpu.memory_space<vmem>>, vector<1x1x8x9xbf16>
    %304 = vector.shape_cast %303 : vector<1x1x8x9xbf16> to vector<8x9xbf16>
    %c1_252 = arith.constant 1 : index
    %c0_253 = arith.constant 0 : index
    %c0_254 = arith.constant 0 : index
    %305 = vector.load %arg2[%c1_252, %c0_253, %c0_254] : memref<3x4x12xbf16, #tpu.memory_space<vmem>>, vector<1x4x8xbf16>
    %306 = vector.shape_cast %305 : vector<1x4x8xbf16> to vector<4x8xbf16>
    %c1_255 = arith.constant 1 : index
    %c0_256 = arith.constant 0 : index
    %c8_257 = arith.constant 8 : index
    %307 = vector.load %arg2[%c1_255, %c0_256, %c8_257] : memref<3x4x12xbf16, #tpu.memory_space<vmem>>, vector<1x4x4xbf16>
    %308 = vector.shape_cast %307 : vector<1x4x4xbf16> to vector<4x4xbf16>
    %309 = vector.extract_strided_slice %304 {offsets = [0, 0], sizes = [8, 8], strides = [1, 1]} : vector<8x9xbf16> to vector<8x8xbf16>
    %cst_258 = arith.constant dense<0.000000e+00> : vector<4x8xf32>
    %310 = tpu.matmul %306, %309, %cst_258 {dimension_numbers = #tpu.dot_dimension_numbers<[1], [0], [0], [1], [0, 0, 1, 1], [], []>} : vector<4x8xbf16>, vector<8x8xbf16>, vector<4x8xf32> -> vector<4x8xf32>
    %311 = arith.addf %302, %310 : vector<4x8xf32>
    %312 = vector.extract_strided_slice %304 {offsets = [0, 1], sizes = [4, 8], strides = [1, 1]} : vector<8x9xbf16> to vector<4x8xbf16>
    %cst_259 = arith.constant dense<0.000000e+00> : vector<4x8xf32>
    %313 = tpu.matmul %308, %312, %cst_259 {dimension_numbers = #tpu.dot_dimension_numbers<[1], [0], [0], [1], [0, 0, 1, 1], [], []>} : vector<4x4xbf16>, vector<4x8xbf16>, vector<4x8xf32> -> vector<4x8xf32>
    %314 = arith.addf %311, %313 : vector<4x8xf32>
    %c0_260 = arith.constant 0 : index
    %c14 = arith.constant 14 : index
    %c0_261 = arith.constant 0 : index
    %c0_262 = arith.constant 0 : index
    %315 = vector.load %arg3[%c0_260, %c14, %c0_261, %c0_262] : memref<1x16x8x9xbf16, #tpu.memory_space<vmem>>, vector<1x1x8x9xbf16>
    %316 = vector.shape_cast %315 : vector<1x1x8x9xbf16> to vector<8x9xbf16>
    %c2_263 = arith.constant 2 : index
    %c0_264 = arith.constant 0 : index
    %c0_265 = arith.constant 0 : index
    %317 = vector.load %arg2[%c2_263, %c0_264, %c0_265] : memref<3x4x12xbf16, #tpu.memory_space<vmem>>, vector<1x4x8xbf16>
    %318 = vector.shape_cast %317 : vector<1x4x8xbf16> to vector<4x8xbf16>
    %c2_266 = arith.constant 2 : index
    %c0_267 = arith.constant 0 : index
    %c8_268 = arith.constant 8 : index
    %319 = vector.load %arg2[%c2_266, %c0_267, %c8_268] : memref<3x4x12xbf16, #tpu.memory_space<vmem>>, vector<1x4x4xbf16>
    %320 = vector.shape_cast %319 : vector<1x4x4xbf16> to vector<4x4xbf16>
    %321 = vector.extract_strided_slice %316 {offsets = [0, 0], sizes = [8, 8], strides = [1, 1]} : vector<8x9xbf16> to vector<8x8xbf16>
    %cst_269 = arith.constant dense<0.000000e+00> : vector<4x8xf32>
    %322 = tpu.matmul %318, %321, %cst_269 {dimension_numbers = #tpu.dot_dimension_numbers<[1], [0], [0], [1], [0, 0, 1, 1], [], []>} : vector<4x8xbf16>, vector<8x8xbf16>, vector<4x8xf32> -> vector<4x8xf32>
    %323 = arith.addf %314, %322 : vector<4x8xf32>
    %324 = vector.extract_strided_slice %316 {offsets = [0, 1], sizes = [4, 8], strides = [1, 1]} : vector<8x9xbf16> to vector<4x8xbf16>
    %cst_270 = arith.constant dense<0.000000e+00> : vector<4x8xf32>
    %325 = tpu.matmul %320, %324, %cst_270 {dimension_numbers = #tpu.dot_dimension_numbers<[1], [0], [0], [1], [0, 0, 1, 1], [], []>} : vector<4x4xbf16>, vector<4x8xbf16>, vector<4x8xf32> -> vector<4x8xf32>
    %326 = arith.addf %323, %325 : vector<4x8xf32>
    %327 = arith.truncf %326 : vector<4x8xf32> to vector<4x8xbf16>
    %c0_271 = arith.constant 0 : index
    %c0_272 = arith.constant 0 : index
    %c48 = arith.constant 48 : index
    %328 = vector.load %arg5[%c0_271, %c0_272, %c48] : memref<1x4x64xbf16, #tpu.memory_space<vmem>>, vector<1x4x8xbf16>
    %329 = vector.shape_cast %328 : vector<1x4x8xbf16> to vector<4x8xbf16>
    %330 = vector.shape_cast %327 : vector<4x8xbf16> to vector<1x4x8xbf16>
    tpu.vector_store %arg5[%c0_271, %c0_272, %c48], %330 {strides = array<i32>} : memref<1x4x64xbf16, #tpu.memory_space<vmem>>, vector<1x4x8xbf16>,
    %cst_273 = arith.constant dense<0.000000e+00> : vector<4xf32>
    %331 = vector.multi_reduction <add>, %326, %cst_273 [1] : vector<4x8xf32> to vector<4xf32>
    %332 = vector.shape_cast %331 : vector<4xf32> to vector<4x1xf32>
    %333 = arith.addf %285, %332 : vector<4x1xf32>
    %334 = arith.mulf %326, %326 : vector<4x8xf32>
    %cst_274 = arith.constant dense<0.000000e+00> : vector<4xf32>
    %335 = vector.multi_reduction <add>, %334, %cst_274 [1] : vector<4x8xf32> to vector<4xf32>
    %336 = vector.shape_cast %335 : vector<4xf32> to vector<4x1xf32>
    %337 = arith.addf %289, %336 : vector<4x1xf32>
    %cst_275 = arith.constant 0.000000e+00 : f32
    %338 = vector.broadcast %cst_275 : f32 to vector<4x8xf32>
    %c0_276 = arith.constant 0 : index
    %c14_277 = arith.constant 14 : index
    %c0_278 = arith.constant 0 : index
    %c0_279 = arith.constant 0 : index
    %339 = vector.load %arg3[%c0_276, %c14_277, %c0_278, %c0_279] : memref<1x16x8x9xbf16, #tpu.memory_space<vmem>>, vector<1x1x8x9xbf16>
    %340 = vector.shape_cast %339 : vector<1x1x8x9xbf16> to vector<8x9xbf16>
    %c0_280 = arith.constant 0 : index
    %c0_281 = arith.constant 0 : index
    %c0_282 = arith.constant 0 : index
    %341 = vector.load %arg2[%c0_280, %c0_281, %c0_282] : memref<3x4x12xbf16, #tpu.memory_space<vmem>>, vector<1x4x8xbf16>
    %342 = vector.shape_cast %341 : vector<1x4x8xbf16> to vector<4x8xbf16>
    %c0_283 = arith.constant 0 : index
    %c0_284 = arith.constant 0 : index
    %c8_285 = arith.constant 8 : index
    %343 = vector.load %arg2[%c0_283, %c0_284, %c8_285] : memref<3x4x12xbf16, #tpu.memory_space<vmem>>, vector<1x4x4xbf16>
    %344 = vector.shape_cast %343 : vector<1x4x4xbf16> to vector<4x4xbf16>
    %345 = vector.extract_strided_slice %340 {offsets = [0, 0], sizes = [8, 8], strides = [1, 1]} : vector<8x9xbf16> to vector<8x8xbf16>
    %cst_286 = arith.constant dense<0.000000e+00> : vector<4x8xf32>
    %346 = tpu.matmul %342, %345, %cst_286 {dimension_numbers = #tpu.dot_dimension_numbers<[1], [0], [0], [1], [0, 0, 1, 1], [], []>} : vector<4x8xbf16>, vector<8x8xbf16>, vector<4x8xf32> -> vector<4x8xf32>
    %347 = arith.addf %338, %346 : vector<4x8xf32>
    %348 = vector.extract_strided_slice %340 {offsets = [0, 1], sizes = [4, 8], strides = [1, 1]} : vector<8x9xbf16> to vector<4x8xbf16>
    %cst_287 = arith.constant dense<0.000000e+00> : vector<4x8xf32>
    %349 = tpu.matmul %344, %348, %cst_287 {dimension_numbers = #tpu.dot_dimension_numbers<[1], [0], [0], [1], [0, 0, 1, 1], [], []>} : vector<4x4xbf16>, vector<4x8xbf16>, vector<4x8xf32> -> vector<4x8xf32>
    %350 = arith.addf %347, %349 : vector<4x8xf32>
    %c0_288 = arith.constant 0 : index
    %c15 = arith.constant 15 : index
    %c0_289 = arith.constant 0 : index
    %c0_290 = arith.constant 0 : index
    %351 = vector.load %arg3[%c0_288, %c15, %c0_289, %c0_290] : memref<1x16x8x9xbf16, #tpu.memory_space<vmem>>, vector<1x1x8x9xbf16>
    %352 = vector.shape_cast %351 : vector<1x1x8x9xbf16> to vector<8x9xbf16>
    %c1_291 = arith.constant 1 : index
    %c0_292 = arith.constant 0 : index
    %c0_293 = arith.constant 0 : index
    %353 = vector.load %arg2[%c1_291, %c0_292, %c0_293] : memref<3x4x12xbf16, #tpu.memory_space<vmem>>, vector<1x4x8xbf16>
    %354 = vector.shape_cast %353 : vector<1x4x8xbf16> to vector<4x8xbf16>
    %c1_294 = arith.constant 1 : index
    %c0_295 = arith.constant 0 : index
    %c8_296 = arith.constant 8 : index
    %355 = vector.load %arg2[%c1_294, %c0_295, %c8_296] : memref<3x4x12xbf16, #tpu.memory_space<vmem>>, vector<1x4x4xbf16>
    %356 = vector.shape_cast %355 : vector<1x4x4xbf16> to vector<4x4xbf16>
    %357 = vector.extract_strided_slice %352 {offsets = [0, 0], sizes = [8, 8], strides = [1, 1]} : vector<8x9xbf16> to vector<8x8xbf16>
    %cst_297 = arith.constant dense<0.000000e+00> : vector<4x8xf32>
    %358 = tpu.matmul %354, %357, %cst_297 {dimension_numbers = #tpu.dot_dimension_numbers<[1], [0], [0], [1], [0, 0, 1, 1], [], []>} : vector<4x8xbf16>, vector<8x8xbf16>, vector<4x8xf32> -> vector<4x8xf32>
    %359 = arith.addf %350, %358 : vector<4x8xf32>
    %360 = vector.extract_strided_slice %352 {offsets = [0, 1], sizes = [4, 8], strides = [1, 1]} : vector<8x9xbf16> to vector<4x8xbf16>
    %cst_298 = arith.constant dense<0.000000e+00> : vector<4x8xf32>
    %361 = tpu.matmul %356, %360, %cst_298 {dimension_numbers = #tpu.dot_dimension_numbers<[1], [0], [0], [1], [0, 0, 1, 1], [], []>} : vector<4x4xbf16>, vector<4x8xbf16>, vector<4x8xf32> -> vector<4x8xf32>
    %362 = arith.addf %359, %361 : vector<4x8xf32>
    %c0_299 = arith.constant 0 : index
    %c0_300 = arith.constant 0 : index
    %c0_301 = arith.constant 0 : index
    %c0_302 = arith.constant 0 : index
    %363 = vector.load %arg4[%c0_299, %c0_300, %c0_301, %c0_302] : memref<1x1x8x9xbf16, #tpu.memory_space<vmem>>, vector<1x1x8x9xbf16>
    %364 = vector.shape_cast %363 : vector<1x1x8x9xbf16> to vector<8x9xbf16>
    %c2_303 = arith.constant 2 : index
    %c0_304 = arith.constant 0 : index
    %c0_305 = arith.constant 0 : index
    %365 = vector.load %arg2[%c2_303, %c0_304, %c0_305] : memref<3x4x12xbf16, #tpu.memory_space<vmem>>, vector<1x4x8xbf16>
    %366 = vector.shape_cast %365 : vector<1x4x8xbf16> to vector<4x8xbf16>
    %c2_306 = arith.constant 2 : index
    %c0_307 = arith.constant 0 : index
    %c8_308 = arith.constant 8 : index
    %367 = vector.load %arg2[%c2_306, %c0_307, %c8_308] : memref<3x4x12xbf16, #tpu.memory_space<vmem>>, vector<1x4x4xbf16>
    %368 = vector.shape_cast %367 : vector<1x4x4xbf16> to vector<4x4xbf16>
    %369 = vector.extract_strided_slice %364 {offsets = [0, 0], sizes = [8, 8], strides = [1, 1]} : vector<8x9xbf16> to vector<8x8xbf16>
    %cst_309 = arith.constant dense<0.000000e+00> : vector<4x8xf32>
    %370 = tpu.matmul %366, %369, %cst_309 {dimension_numbers = #tpu.dot_dimension_numbers<[1], [0], [0], [1], [0, 0, 1, 1], [], []>} : vector<4x8xbf16>, vector<8x8xbf16>, vector<4x8xf32> -> vector<4x8xf32>
    %371 = arith.addf %362, %370 : vector<4x8xf32>
    %372 = vector.extract_strided_slice %364 {offsets = [0, 1], sizes = [4, 8], strides = [1, 1]} : vector<8x9xbf16> to vector<4x8xbf16>
    %cst_310 = arith.constant dense<0.000000e+00> : vector<4x8xf32>
    %373 = tpu.matmul %368, %372, %cst_310 {dimension_numbers = #tpu.dot_dimension_numbers<[1], [0], [0], [1], [0, 0, 1, 1], [], []>} : vector<4x4xbf16>, vector<4x8xbf16>, vector<4x8xf32> -> vector<4x8xf32>
    %374 = arith.addf %371, %373 : vector<4x8xf32>
    %375 = arith.truncf %374 : vector<4x8xf32> to vector<4x8xbf16>
    %c0_311 = arith.constant 0 : index
    %c0_312 = arith.constant 0 : index
    %c56 = arith.constant 56 : index
    %376 = vector.load %arg5[%c0_311, %c0_312, %c56] : memref<1x4x64xbf16, #tpu.memory_space<vmem>>, vector<1x4x8xbf16>
    %377 = vector.shape_cast %376 : vector<1x4x8xbf16> to vector<4x8xbf16>
    %378 = vector.shape_cast %375 : vector<4x8xbf16> to vector<1x4x8xbf16>
    tpu.vector_store %arg5[%c0_311, %c0_312, %c56], %378 {strides = array<i32>} : memref<1x4x64xbf16, #tpu.memory_space<vmem>>, vector<1x4x8xbf16>,
    %cst_313 = arith.constant dense<0.000000e+00> : vector<4xf32>
    %379 = vector.multi_reduction <add>, %374, %cst_313 [1] : vector<4x8xf32> to vector<4xf32>
    %380 = vector.shape_cast %379 : vector<4xf32> to vector<4x1xf32>
    %381 = arith.addf %333, %380 : vector<4x1xf32>
    %382 = arith.mulf %374, %374 : vector<4x8xf32>
    %cst_314 = arith.constant dense<0.000000e+00> : vector<4xf32>
    %383 = vector.multi_reduction <add>, %382, %cst_314 [1] : vector<4x8xf32> to vector<4xf32>
    %384 = vector.shape_cast %383 : vector<4xf32> to vector<4x1xf32>
    %385 = arith.addf %337, %384 : vector<4x1xf32>
    %c0_315 = arith.constant 0 : index
    %c0_316 = arith.constant 0 : index
    %c0_317 = arith.constant 0 : index
    %c0_318 = arith.constant 0 : index
    %386 = vector.load %arg6[%c0_315, %c0_316, %c0_317, %c0_318] : memref<1x1x4x1xf32, #tpu.memory_space<vmem>>, vector<1x1x4x1xf32>
    %387 = vector.shape_cast %386 : vector<1x1x4x1xf32> to vector<4x1xf32>
    %388 = vector.shape_cast %381 : vector<4x1xf32> to vector<1x1x4x1xf32>
    tpu.vector_store %arg6[%c0_315, %c0_316, %c0_317, %c0_318], %388 {strides = array<i32>} : memref<1x1x4x1xf32, #tpu.memory_space<vmem>>, vector<1x1x4x1xf32>,
    %c0_319 = arith.constant 0 : index
    %c0_320 = arith.constant 0 : index
    %c0_321 = arith.constant 0 : index
    %c0_322 = arith.constant 0 : index
    %389 = vector.load %arg7[%c0_319, %c0_320, %c0_321, %c0_322] : memref<1x1x4x1xf32, #tpu.memory_space<vmem>>, vector<1x1x4x1xf32>
    %390 = vector.shape_cast %389 : vector<1x1x4x1xf32> to vector<4x1xf32>
    %391 = vector.shape_cast %385 : vector<4x1xf32> to vector<1x1x4x1xf32>
    tpu.vector_store %arg7[%c0_319, %c0_320, %c0_321, %c0_322], %391 {strides = array<i32>} : memref<1x1x4x1xf32, #tpu.memory_space<vmem>>, vector<1x1x4x1xf32>,
    return
  }
  func.func @transform_0(%arg0: i32, %arg1: i32) -> (i32, i32, i32) {
    %c0_i32 = arith.constant 0 : i32
    %c0_i32_0 = arith.constant 0 : i32
    %c0_i32_1 = arith.constant 0 : i32
    %c0_i32_2 = arith.constant 0 : i32
    return %c0_i32, %c0_i32_0, %c0_i32_1 : i32, i32, i32
  }
  func.func @transform_1(%arg0: i32, %arg1: i32) -> (i32, i32, i32, i32) {
    %c0_i32 = arith.constant 0 : i32
    %c0_i32_0 = arith.constant 0 : i32
    %c0_i32_1 = arith.constant 0 : i32
    return %arg0, %arg1, %c0_i32, %c0_i32_0 : i32, i32, i32, i32
  }
  func.func @transform_2(%arg0: i32, %arg1: i32) -> (i32, i32, i32, i32) {
    %c1_i32 = arith.constant 1 : i32
    %0 = arith.addi %arg1, %c1_i32 : i32
    %c16_i32 = arith.constant 16 : i32
    %1 = arith.muli %c16_i32, %0 : i32
    %c0_i32 = arith.constant 0 : i32
    %c0_i32_0 = arith.constant 0 : i32
    %c0_i32_1 = arith.constant 0 : i32
    return %arg0, %1, %c0_i32, %c0_i32_0 : i32, i32, i32, i32
  }
  func.func @transform_3(%arg0: i32, %arg1: i32) -> (i32, i32, i32) {
    %c0_i32 = arith.constant 0 : i32
    %c0_i32_0 = arith.constant 0 : i32
    return %arg0, %c0_i32, %arg1 : i32, i32, i32
  }
  func.func @transform_4(%arg0: i32, %arg1: i32) -> (i32, i32, i32, i32) {
    %c0_i32 = arith.constant 0 : i32
    %c0_i32_0 = arith.constant 0 : i32
    %c0_i32_1 = arith.constant 0 : i32
    return %arg0, %arg1, %c0_i32, %c0_i32_0 : i32, i32, i32, i32
  }
  func.func @transform_5(%arg0: i32, %arg1: i32) -> (i32, i32, i32, i32) {
    %c0_i32 = arith.constant 0 : i32
    %c0_i32_0 = arith.constant 0 : i32
    %c0_i32_1 = arith.constant 0 : i32
    return %arg0, %arg1, %c0_i32, %c0_i32_0 : i32, i32, i32, i32
  }
}

module attributes {stable_mosaic.version = 11 : i64} {
  func.func @_bn_lrelu_kernel(%arg0: i32, %arg1: i32, %arg2: memref<2x4x1xf32, #tpu.memory_space<vmem>>, %arg3: memref<1x4x64xbf16, #tpu.memory_space<vmem>>, %arg4: memref<1x4x64xf32, #tpu.memory_space<vmem>>) attributes {dimension_semantics = [#tpu.dimension_semantics<parallel>, #tpu.dimension_semantics<parallel>], iteration_bounds = array<i64: 2, 1>, scalar_prefetch = 0 : i64, scratch_operands = 0 : i64, tpu.core_type = #tpu.core_type<tc>, window_params = [{pipeline_mode = #tpu.pipeline_mode<synchronous>, transform_indices = @transform_0, window_bounds = array<i64: 2, 4, 1>}, {transform_indices = @transform_1, window_bounds = array<i64: 1, 4, 64>}, {transform_indices = @transform_2, window_bounds = array<i64: 1, 4, 64>}]} {
    %c0 = arith.constant 0 : index
    %c0_0 = arith.constant 0 : index
    %c0_1 = arith.constant 0 : index
    %0 = vector.load %arg2[%c0, %c0_0, %c0_1] : memref<2x4x1xf32, #tpu.memory_space<vmem>>, vector<1x4x1xf32>
    %1 = vector.shape_cast %0 : vector<1x4x1xf32> to vector<4x1xf32>
    %c1 = arith.constant 1 : index
    %c0_2 = arith.constant 0 : index
    %c0_3 = arith.constant 0 : index
    %2 = vector.load %arg2[%c1, %c0_2, %c0_3] : memref<2x4x1xf32, #tpu.memory_space<vmem>>, vector<1x4x1xf32>
    %3 = vector.shape_cast %2 : vector<1x4x1xf32> to vector<4x1xf32>
    %c0_4 = arith.constant 0 : index
    %c0_5 = arith.constant 0 : index
    %c0_6 = arith.constant 0 : index
    %4 = vector.load %arg3[%c0_4, %c0_5, %c0_6] : memref<1x4x64xbf16, #tpu.memory_space<vmem>>, vector<1x4x64xbf16>
    %5 = vector.shape_cast %4 : vector<1x4x64xbf16> to vector<4x64xbf16>
    %6 = arith.extf %5 : vector<4x64xbf16> to vector<4x64xf32>
    %7 = vector.broadcast %1 : vector<4x1xf32> to vector<4x64xf32>
    %8 = arith.mulf %6, %7 : vector<4x64xf32>
    %9 = vector.broadcast %3 : vector<4x1xf32> to vector<4x64xf32>
    %10 = arith.addf %8, %9 : vector<4x64xf32>
    %cst = arith.constant 0.000000e+00 : f32
    %11 = vector.broadcast %cst : f32 to vector<4x64xf32>
    %12 = arith.cmpf oge, %10, %11 : vector<4x64xf32>
    %cst_7 = arith.constant 0.00999999977 : f32
    %13 = vector.broadcast %cst_7 : f32 to vector<4x64xf32>
    %14 = arith.mulf %13, %10 : vector<4x64xf32>
    %15 = arith.select %12, %10, %14 : vector<4x64xi1>, vector<4x64xf32>
    %c0_8 = arith.constant 0 : index
    %c0_9 = arith.constant 0 : index
    %c0_10 = arith.constant 0 : index
    %16 = vector.load %arg4[%c0_8, %c0_9, %c0_10] : memref<1x4x64xf32, #tpu.memory_space<vmem>>, vector<1x4x64xf32>
    %17 = vector.shape_cast %16 : vector<1x4x64xf32> to vector<4x64xf32>
    %18 = vector.shape_cast %15 : vector<4x64xf32> to vector<1x4x64xf32>
    tpu.vector_store %arg4[%c0_8, %c0_9, %c0_10], %18 {strides = array<i32>} : memref<1x4x64xf32, #tpu.memory_space<vmem>>, vector<1x4x64xf32>,
    return
  }
  func.func @transform_0(%arg0: i32, %arg1: i32) -> (i32, i32, i32) {
    %c0_i32 = arith.constant 0 : i32
    %c0_i32_0 = arith.constant 0 : i32
    %c0_i32_1 = arith.constant 0 : i32
    %c0_i32_2 = arith.constant 0 : i32
    return %c0_i32, %c0_i32_0, %c0_i32_1 : i32, i32, i32
  }
  func.func @transform_1(%arg0: i32, %arg1: i32) -> (i32, i32, i32) {
    %c0_i32 = arith.constant 0 : i32
    %c0_i32_0 = arith.constant 0 : i32
    return %arg0, %c0_i32, %arg1 : i32, i32, i32
  }
  func.func @transform_2(%arg0: i32, %arg1: i32) -> (i32, i32, i32) {
    %c0_i32 = arith.constant 0 : i32
    %c0_i32_0 = arith.constant 0 : i32
    return %arg0, %c0_i32, %arg1 : i32, i32, i32
  }
}

</mosaic_0001>

<bundles_post_ra>
// kernel: downsample.3
= control target key start
LH: loop header
LB: loop body
LE: loop exit
PB: predicated region body
PF: predicated region fallthrough
CT: control target
= control target key end

     0   :  { %s342_s9 = smov 0   ;;  %s344_s10 = smov 0   ;;  %s381_s0 = inlined_call_operand.vmem [shape: f32[2,4,1], index: 0, kind: input, shape index: {}]   ;;  %s382_s1 = inlined_call_operand.vmem [shape: bf16[2,4,64], index: 1, kind: input, shape index: {}]   ;;  %s383_s2 = inlined_call_operand.vmem [shape: f32[2,4,64], index: 2, kind: output, shape index: {}]  }
   0x1   :  { %s346_s11 = smov 0  }
   0x2 LB: > { %s24_s12 = sadd.s32 1, %s320_s10  ;;  %p270_p0 = scmp.ge.s32.totalorder %s324_s11, 1  ;;  %s324_s11 = sphi %s346_s11, %s12_s11   ;;  %s320_s10 = sphi %s344_s10, %s385_s10   ;;  %s316_s9 = sphi %s342_s9, %s384_s9  }
   0x3   : > { %p26_p1 = scmp.ge.s32.totalorder %s24_s12, 2  ;;  %p130_p2 = scmp.lt.s32.totalorder %s324_s11, 3 }
   0x5   : > { %s387_s12 = smov (%p26_p1, %s24_s12), 0  ;;  %p131_p3 = pnand %p270_p0, %p130_p2 }
   0x6   : > { %p156_p4 = scmp.lt.s32.totalorder (!%p131_p3), %s316_s9, 1 }
   0x7   : > { %134 = sbr.rel (%p131_p3) target bundleno = 148 (0x94), region = 28 }
   0xc   : > { %v170_v0 = vld [vmem:[%s381_s0] sm:$0xf]  ;;  %v326_v1 = vmov 0   ;;  %v273_v2 = vld [vmem:[%s381_s0 + $0x4] sm:$0xf]  ;;  %s389_s9 = smov (!%p156_p4, %s316_s9), 1 }
   0xd   : > { %301 = vset.pattern.permute.xlu0 %v326_v1  ;;  %s271_s17 = sshll.u32 %s389_s9, 1  ;;  %s272_s21 = sshll.u32 %s389_s9, 2  ;;  %vm190_vm0 = vcmask 519168  }
   0xe   : > { %177 = vperm.xlu0 %301, %v170_v0   ;;  %s162_s20 = scalar_lea.vmem %s382_s1, %s271_s17  ;;  %s169_s24 = scalar_lea.vmem %s383_s2, %s272_s21 }
   0xf   : > { %v173_v3 = vld [vmem:[%s162_s20] sm:$0x3] }
  0x10   : > { %v174_v4 = vunpack.c.l.bf16 %v173_v3 }
  0x12   : > { %183 = vperm.xlu0 %301, %v273_v2  }
  0x89   : > { %v178_v5 = vpop.permute.xlu0 %177 }
  0x8a   : > { %v180_v6 = vmul.f32 %v178_v5, %v174_v4 }
  0x8d   : > { %v184_v7 = vpop.permute.xlu0 %183 }
  0x8e   : > { %v186_v8 = vadd.f32 %v184_v7, %v180_v6 }
  0x90   : > { %vm187_vm1 = vcmp.ge.f32.partialorder %v186_v8, 0.0  ;;  %v188_v9 = vmul.f32 0.01, %v186_v8 }
  0x92   : > { %v189_v10 = vsel %vm187_vm1, %v186_v8, %v188_v9 }
  0x93   : > { %191 = vst.msk [vmem:[%s169_s24] sm:$0xf] %vm190_vm0, %v189_v10 }
  0x94 PF: > { %s12_s11 = sadd.s32 1, %s324_s11   ;;  %s384_s9 = smov %s320_s10 }
  0x95   : > { %p9_p5 = scmp.ge.s32.totalorder %s12_s11, 4   ;;  %s385_s10 = smov %s387_s12 }
  0x97   :  { %11 = sbr.rel (!%p9_p5) target bundleno = 2 (0x2), region = 59 }

// kernel: downsample.2
= control target key start
LH: loop header
LB: loop body
LE: loop exit
PB: predicated region body
PF: predicated region fallthrough
CT: control target
= control target key end

     0   :  { %s4022_s18 = smov 0   ;;  %s4024_s19 = smov 0   ;;  %s4734_s0 = inlined_call_operand.vmem [shape: bf16[3,4,12], index: 0, kind: input, shape index: {}]   ;;  %s4735_s1 = inlined_call_operand.vmem [shape: bf16[2,18,8,9], index: 1, kind: input, shape index: {}, may-alias: {1,2}]   ;;  %s4736_s2 = inlined_call_operand.vmem [shape: bf16[2,18,8,9], index: 2, kind: input, shape index: {}, may-alias: {1,2}]   ;;  %s4737_s3 = inlined_call_operand.vmem [shape: bf16[2,4,64], index: 3, kind: output, shape index: {0}]   ;;  %s4738_s4 = inlined_call_operand.vmem [shape: f32[2,1,4,1], index: 4, kind: output, shape index: {1}]   ;;  %s4739_s5 = inlined_call_operand.vmem [shape: f32[2,1,4,1], index: 5, kind: output, shape index: {2}]  }
   0x1   :  { %s4026_s20 = smov 0  }
   0x2 LB: > { %s28_s21 = sadd.s32 1, %s3974_s19  ;;  %p3389_p0 = scmp.ge.s32.totalorder %s3978_s20, 1  ;;  %s3978_s20 = sphi %s4026_s20, %s16_s20   ;;  %s3974_s19 = sphi %s4024_s19, %s4741_s19   ;;  %s3970_s18 = sphi %s4022_s18, %s4740_s18  }
   0x3   : > { %p30_p1 = scmp.ge.s32.totalorder %s28_s21, 2  ;;  %p248_p2 = scmp.lt.s32.totalorder %s3978_s20, 3 }
   0x5   : > { %s4743_s21 = smov (%p30_p1, %s28_s21), 0  ;;  %p249_p3 = pnand %p3389_p0, %p248_p2 }
   0x6   : > { %p315_p4 = scmp.lt.s32.totalorder (!%p249_p3), %s3970_s18, 1  ;;  %s3983_s30 = smov (!%p249_p3), 127  }
   0x7   : > { %252 = sbr.rel (%p249_p3) target bundleno = 676 (0x2a4), region = 32  ;;  %s3984_s8 = smov (!%p249_p3), 120  }
   0x8   : > { %s3985_s27 = smov (!%p249_p3), 8   ;;  %s3986_s28 = smov (!%p249_p3), 16  }
   0x9   : > { %s3987_s29 = smov (!%p249_p3), 24   ;;  %s3988_s6 = smov (!%p249_p3), 32  }
   0xa   : > { %s3989_s7 = smov (!%p249_p3), 40   ;;  %s3990_s9 = smov (!%p249_p3), 56  }
   0xb   : > { %s3991_s10 = smov (!%p249_p3), 48  }
   0xc   : > { %v368_v0 = vlaneseq  ;;  %v3980_v1 = vmov 1983009808   ;;  %s4745_s18 = smov (!%p315_p4, %s3970_s18), 1  ;;  %v3981_v4 = vmov 0.0   ;;  %v363_v6 = vld [vmem:[%s4734_s0] sm:$0x3] }
   0xd   : > { %v366_v2 = vunpack.c.l.s4 %v3980_v1  ;;  %3611 = vmatprep.subr.bf16.mxu1 %v3981_v4  ;;  %3605 = vmatprep.subr.bf16.mxu0 %v3981_v4  ;;  %s3893_s22 = smul.u32 72, %s4745_s18  ;;  %v4060_v8 = vld [vmem:[%s4734_s0 + $0x2] sm:$0x3]  ;;  %vm3982_vm0 = vmmov 0   ;;  %vm431_vm1 = vcmask 1043456   ;;  %vm427_vm2 = vcmask 64512  }
   0xe   : > { %v369_v3 = vshrl.u32 %v368_v0, 7  ;;  %3613 = vmatprep.mubr.msk.bf16.mxu1 %vm3982_vm0, %v3981_v4  ;;  %3607 = vmatprep.mubr.msk.bf16.mxu0 %vm3982_vm0, %v3981_v4  ;;  %v4084_v17 = vld [vmem:[%s4734_s0 + $0x4] sm:$0x3]  ;;  %v4099_v21 = vld [vmem:[%s4734_s0] sm:$0x3]  ;;  %vm383_vm3 = vcmask 1041408  }
   0xf   : > { %v367_v5 = vunpack.c.0.s8 %v366_v2  ;;  %s4050_s25 = scalar_lea.vmem %s4735_s1, %s3893_s22  ;;  %v4116_v25 = vld [vmem:[%s4734_s0 + $0x2] sm:$0x3]  ;;  %v4130_v29 = vld [vmem:[%s4734_s0 + $0x4] sm:$0x3]  ;;  %v4144_v33 = vld [vmem:[%s4734_s0] sm:$0x3] }
  0x10   : > { %v362_v9 = vld [vmem:[%s4050_s25] sm:$0xf]  ;;  %v4068_v10 = vld [vmem:[%s4050_s25 + $0x4] sm:$0xf]  ;;  %v4079_v16 = vld [vmem:[%s4050_s25 + $0x8] sm:$0xf] }
  0x11   : > { %v4055_v7 = vsub.s32 %v367_v5, %v369_v3  ;;  %v3395_v11 = vcombine.low %v362_v9, %v362_v9  ;;  %v3401_v12 = vcombine.low %v4068_v10, %v4068_v10  ;;  %v433_v15 = vsel %vm431_vm1, %v362_v9, 0  ;;  %v4094_v20 = vld [vmem:[%s4050_s25 + $0x8] sm:$0xf]  ;;  %v4111_v24 = vld [vmem:[%s4050_s25 + $0xc] sm:$0xf]  ;;  %s3508_s13 = sadd.s32 64, %s3893_s22 }
  0x12   : > { %3612 = vmatpush3.bf16.msra.mxu1 %v433_v15  ;;  %v3406_v18 = vcombine.low %v4079_v16, %v4079_v16  ;;  %v3409_v22 = vcombine.low %v4094_v20, %v4094_v20  ;;  %v3415_v26 = vcombine.low %v4111_v24, %v4111_v24  ;;  %v4125_v28 = vld [vmem:[%s4050_s25 + $0x10] sm:$0xf]  ;;  %v4153_v36 = vld [vmem:[%s4050_s25 + $0x14] sm:$0xf]  ;;  %v4158_v37 = vld [vmem:[%s4734_s0 + $0x2] sm:$0x3]  ;;  %s337_s22 = scalar_lea.vmem %s4736_s2, %s3508_s13 }
  0x13   : > { %377 = vrot.lane.b32.xlu0 %v3395_v11, %s3983_s30  ;;  %v371_v13 = vrot.slane %v363_v6, %v4055_v7  ;;  %539 = vrot.lane.b32.xlu1 %v3401_v12, %s3983_s30  ;;  %v533_v14 = vrot.slane %v4060_v8, %v4055_v7  ;;  %v646_v19 = vrot.slane %v4084_v17, %v4055_v7  ;;  %v4139_v32 = vld [vmem:[%s4050_s25 + $0x10] sm:$0xf]  ;;  %v4167_v40 = vld [vmem:[%s4050_s25 + $0x18] sm:$0xf]  ;;  %vm379_vm4 = vcmask 31744   ;;  %s3393_s11 = sshll.u32 %s4745_s18, 2 }
  0x14   : > { %3623 = vmatprep.subr.bf16.mxu1 %v3981_v4  ;;  %v723_v23 = vrot.slane %v4099_v21, %v4055_v7  ;;  %v880_v27 = vrot.slane %v4116_v25, %v4055_v7  ;;  %v3420_v30 = vcombine.low %v4125_v28, %v4125_v28  ;;  %v992_v31 = vrot.slane %v4130_v29, %v4055_v7  ;;  %v4172_v41 = vld [vmem:[%s4734_s0 + $0x4] sm:$0x3]  ;;  %v4181_v44 = vld [vmem:[%s4050_s25 + $0x18] sm:$0xf]  ;;  %v4186_v45 = vld [vmem:[%s4734_s0] sm:$0x3]  ;;  %s353_s14 = scalar_lea.vmem %s4738_s4, %s3393_s11  ;;  %s360_s17 = scalar_lea.vmem %s4739_s5, %s3393_s11 }
  0x15   : > { %3614 = vmatmul.mubr.msk.bf16.vlgmr.msra.gmra.mxu1 %vm427_vm2, %v363_v6  ;;  %v3423_v34 = vcombine.low %v4139_v32, %v4139_v32  ;;  %v1079_v35 = vrot.slane %v4144_v33, %v4055_v7  ;;  %v3429_v38 = vcombine.low %v4153_v36, %v4153_v36  ;;  %v1236_v39 = vrot.slane %v4158_v37, %v4055_v7  ;;  %v4195_v48 = vld [vmem:[%s4050_s25 + $0x1c] sm:$0xf]  ;;  %v4200_v49 = vld [vmem:[%s4734_s0 + $0x2] sm:$0x3]  ;;  %v4214_v53 = vld [vmem:[%s4734_s0 + $0x4] sm:$0x3] }
  0x16   : > { %3625 = vmatprep.mubr.msk.bf16.mxu1 %vm3982_vm0, %v3981_v4  ;;  %v3434_v42 = vcombine.low %v4167_v40, %v4167_v40  ;;  %v1348_v43 = vrot.slane %v4172_v41, %v4055_v7  ;;  %v3437_v46 = vcombine.low %v4181_v44, %v4181_v44  ;;  %v1435_v47 = vrot.slane %v4186_v45, %v4055_v7  ;;  %v4209_v52 = vld [vmem:[%s4050_s25 + $0x20] sm:$0xf]  ;;  %v4237_v60 = vld [vmem:[%s4050_s25 + $0x24] sm:$0xf]  ;;  %v4251_v0 = vld [vmem:[%s4050_s25 + $0x28] sm:$0xf] }
  0x17   : > { %372 = vrot.lane.b32.xlu0 %v371_v13, %s3984_s8  ;;  %534 = vrot.lane.b32.xlu1 %v533_v14, %s3984_s8  ;;  %v3443_v50 = vcombine.low %v4195_v48, %v4195_v48  ;;  %v1592_v51 = vrot.slane %v4200_v49, %v4055_v7  ;;  %v3448_v54 = vcombine.low %v4209_v52, %v4209_v52  ;;  %v4223_v56 = vld [vmem:[%s4050_s25 + $0x20] sm:$0xf]  ;;  %v4256_v1 = vld [vmem:[%s4734_s0 + $0x4] sm:$0x3]  ;;  %vm704_vm5 = vcmask 60416  }
  0x18   : > { %v1704_v55 = vrot.slane %v4214_v53, %v4055_v7  ;;  %v4228_v57 = vld [vmem:[%s4734_s0] sm:$0x3]  ;;  %v3451_v58 = vcombine.low %v4223_v56, %v4223_v56  ;;  %v4242_v61 = vld [vmem:[%s4734_s0 + $0x2] sm:$0x3]  ;;  %v3457_v62 = vcombine.low %v4237_v60, %v4237_v60  ;;  %v3462_v2 = vcombine.low %v4251_v0, %v4251_v0  ;;  %v4265_v5 = vld [vmem:[%s4050_s25 + $0x28] sm:$0xf] }
  0x19   : > { %v1791_v59 = vrot.slane %v4228_v57, %v4055_v7  ;;  %v1948_v63 = vrot.slane %v4242_v61, %v4055_v7  ;;  %v2060_v3 = vrot.slane %v4256_v1, %v4055_v7  ;;  %v4270_v6 = vld [vmem:[%s4734_s0] sm:$0x3]  ;;  %v3465_v9 = vcombine.low %v4265_v5, %v4265_v5  ;;  %v4279_v12 = vld [vmem:[%s4050_s25 + $0x2c] sm:$0xf]  ;;  %v4284_v13 = vld [vmem:[%s4734_s0 + $0x2] sm:$0x3] }
  0x1a   : > { %v2147_v11 = vrot.slane %v4270_v6, %v4055_v7  ;;  %v3471_v14 = vcombine.low %v4279_v12, %v4279_v12  ;;  %v2304_v15 = vrot.slane %v4284_v13, %v4055_v7  ;;  %vm702_vm6 = vcmask 58368  }
  0x1b   : > { %652 = vrot.lane.b32.xlu0 %v3406_v18, %s3983_s30  ;;  %647 = vrot.lane.b32.xlu1 %v646_v19, %s3984_s8  ;;  %v4293_v18 = vld [vmem:[%s4050_s25 + $0x30] sm:$0xf]  ;;  %v4298_v19 = vld [vmem:[%s4734_s0 + $0x4] sm:$0x3]  ;;  %vm1059_vm7 = vcmask 123968   ;;  %vm1415_vm8 = vcmask 189568  }
  0x1c   : > { %vm1771_vm9 = vcmask 255168   ;;  %vm2127_vm10 = vcmask 320768   ;;  %vm2483_vm11 = vcmask 386368   ;;  %vm3205_vm12 = vcmask 3072  }
  0x1d   : > { %vm2839_vm13 = vcmask 451968   ;;  %vm3194_vm14 = vcmask 517568  }
  0x1f   : > { %729 = vrot.lane.b32.xlu0 %v3409_v22, %s3983_s30  ;;  %724 = vrot.lane.b32.xlu1 %v723_v23, %s3984_s8  ;;  %v3476_v22 = vcombine.low %v4293_v18, %v4293_v18  ;;  %v2416_v23 = vrot.slane %v4298_v19, %v4055_v7 }
  0x23   : > { %886 = vrot.lane.b32.xlu0 %v3415_v26, %s3983_s30  ;;  %881 = vrot.lane.b32.xlu1 %v880_v27, %s3984_s8  ;;  %v4307_v26 = vld [vmem:[%s4050_s25 + $0x30] sm:$0xf]  ;;  %v4312_v27 = vld [vmem:[%s4734_s0] sm:$0x3] }
  0x27   : > { %998 = vrot.lane.b32.xlu0 %v3420_v30, %s3983_s30  ;;  %993 = vrot.lane.b32.xlu1 %v992_v31, %s3984_s8  ;;  %v3479_v30 = vcombine.low %v4307_v26, %v4307_v26  ;;  %v2503_v31 = vrot.slane %v4312_v27, %v4055_v7 }
  0x2b   : > { %1085 = vrot.lane.b32.xlu0 %v3423_v34, %s3983_s30  ;;  %1080 = vrot.lane.b32.xlu1 %v1079_v35, %s3984_s8  ;;  %v4321_v34 = vld [vmem:[%s4050_s25 + $0x34] sm:$0xf]  ;;  %v4326_v35 = vld [vmem:[%s4734_s0 + $0x2] sm:$0x3] }
  0x2f   : > { %1242 = vrot.lane.b32.xlu0 %v3429_v38, %s3983_s30  ;;  %1237 = vrot.lane.b32.xlu1 %v1236_v39, %s3984_s8  ;;  %v3485_v38 = vcombine.low %v4321_v34, %v4321_v34  ;;  %v2660_v39 = vrot.slane %v4326_v35, %v4055_v7 }
  0x33   : > { %1354 = vrot.lane.b32.xlu0 %v3434_v42, %s3983_s30  ;;  %1349 = vrot.lane.b32.xlu1 %v1348_v43, %s3984_s8  ;;  %v4335_v42 = vld [vmem:[%s4050_s25 + $0x38] sm:$0xf]  ;;  %v4340_v43 = vld [vmem:[%s4734_s0 + $0x4] sm:$0x3] }
  0x37   : > { %1441 = vrot.lane.b32.xlu0 %v3437_v46, %s3983_s30  ;;  %1436 = vrot.lane.b32.xlu1 %v1435_v47, %s3984_s8  ;;  %v3490_v46 = vcombine.low %v4335_v42, %v4335_v42  ;;  %v2772_v47 = vrot.slane %v4340_v43, %v4055_v7 }
  0x3b   : > { %1598 = vrot.lane.b32.xlu0 %v3443_v50, %s3983_s30  ;;  %1593 = vrot.lane.b32.xlu1 %v1592_v51, %s3984_s8  ;;  %v4349_v50 = vld [vmem:[%s4050_s25 + $0x38] sm:$0xf]  ;;  %v4354_v51 = vld [vmem:[%s4734_s0] sm:$0x3] }
  0x3f   : > { %1710 = vrot.lane.b32.xlu0 %v3448_v54, %s3983_s30  ;;  %1705 = vrot.lane.b32.xlu1 %v1704_v55, %s3984_s8  ;;  %v3493_v54 = vcombine.low %v4349_v50, %v4349_v50  ;;  %v2859_v55 = vrot.slane %v4354_v51, %v4055_v7 }
  0x43   : > { %1797 = vrot.lane.b32.xlu0 %v3451_v58, %s3983_s30  ;;  %1792 = vrot.lane.b32.xlu1 %v1791_v59, %s3984_s8  ;;  %v4365_v58 = vld [vmem:[%s4050_s25 + $0x3c] sm:$0xf]  ;;  %v4370_v59 = vld [vmem:[%s4734_s0 + $0x2] sm:$0x3] }
  0x47   : > { %1954 = vrot.lane.b32.xlu0 %v3457_v62, %s3983_s30  ;;  %1949 = vrot.lane.b32.xlu1 %v1948_v63, %s3984_s8  ;;  %v3499_v62 = vcombine.low %v4365_v58, %v4365_v58  ;;  %v3016_v63 = vrot.slane %v4370_v59, %v4055_v7 }
  0x4b   : > { %2066 = vrot.lane.b32.xlu0 %v3462_v2, %s3983_s30  ;;  %2061 = vrot.lane.b32.xlu1 %v2060_v3, %s3984_s8  ;;  %v4381_v2 = vld [vmem:[%s337_s22] sm:$0xf]  ;;  %v4386_v3 = vld [vmem:[%s4734_s0 + $0x4] sm:$0x3] }
  0x4f   : > { %2153 = vrot.lane.b32.xlu0 %v3465_v9, %s3983_s30  ;;  %2148 = vrot.lane.b32.xlu1 %v2147_v11, %s3984_s8  ;;  %v3503_v9 = vcombine.low %v4381_v2, %v4381_v2  ;;  %v3127_v11 = vrot.slane %v4386_v3, %v4055_v7 }
  0x53   : > { %2310 = vrot.lane.b32.xlu0 %v3471_v14, %s3983_s30  ;;  %2305 = vrot.lane.b32.xlu1 %v2304_v15, %s3984_s8 }
  0x57   : > { %2422 = vrot.lane.b32.xlu0 %v3476_v22, %s3983_s30  ;;  %2417 = vrot.lane.b32.xlu1 %v2416_v23, %s3984_s8 }
  0x5b   : > { %2509 = vrot.lane.b32.xlu0 %v3479_v30, %s3983_s30  ;;  %2504 = vrot.lane.b32.xlu1 %v2503_v31, %s3984_s8  ;;  %v483_v30 = vsel %vm431_vm1, %v4068_v10, 0 }
  0x5f   : > { %2666 = vrot.lane.b32.xlu0 %v3485_v38, %s3983_s30  ;;  %2661 = vrot.lane.b32.xlu1 %v2660_v39, %s3984_s8 }
  0x63   : > { %2778 = vrot.lane.b32.xlu0 %v3490_v46, %s3983_s30  ;;  %2773 = vrot.lane.b32.xlu1 %v2772_v47, %s3984_s8  ;;  %v596_v47 = vsel %vm431_vm1, %v4079_v16, 0 }
  0x67   : > { %2865 = vrot.lane.b32.xlu0 %v3493_v54, %s3983_s30  ;;  %2860 = vrot.lane.b32.xlu1 %v2859_v55, %s3984_s8  ;;  %v781_v55 = vsel %vm431_vm1, %v4094_v20, 0 }
  0x6b   : > { %3022 = vrot.lane.b32.xlu0 %v3499_v62, %s3983_s30  ;;  %3017 = vrot.lane.b32.xlu1 %v3016_v63, %s3984_s8 }
  0x6f   : > { %3133 = vrot.lane.b32.xlu0 %v3503_v9, %s3983_s30  ;;  %3128 = vrot.lane.b32.xlu1 %v3127_v11, %s3984_s8  ;;  %s3392_s30 = sshll.u32 %s4745_s18, 1 }
  0x70   : > { %s4678_s26 = scalar_lea.vmem %s4737_s3, %s3392_s30 }
  0x85   : > { %v378_v14 = vpop.permute.xlu0 %377  ;;  %v540_v15 = vpop.permute.xlu1 %539 }
  0x86   : > { %v385_v22 = vsel %vm383_vm3, %v378_v14, 0  ;;  %v545_v23 = vsel %vm383_vm3, %v540_v15, 0  ;;  %v1137_v15 = vsel %vm431_vm1, %v4139_v32, 0 }
  0x87   : > { %3606 = vmatpush3.bf16.msra.mxu0 %v385_v22  ;;  %3624 = vmatpush3.bf16.msra.mxu1 %v545_v23 }
  0x88   : > { %3617 = vmatprep.subr.bf16.mxu0 %v3981_v4  ;;  %3635 = vmatprep.subr.bf16.mxu1 %v3981_v4 }
  0x89   : > { %v373_v31 = vpop.permute.xlu0 %372  ;;  %v535_v38 = vpop.permute.xlu1 %534 }
  0x8a   : > { %3608 = vmatmul.mubr.msk.bf16.vlgmr.msra.gmra.mxu0 %vm379_vm4, %v373_v31  ;;  %3626 = vmatmul.mubr.msk.bf16.vlgmr.msra.gmra.mxu1 %vm379_vm4, %v535_v38  ;;  %v1493_v38 = vsel %vm431_vm1, %v4181_v44, 0 }
  0x8b   : > { %3618 = vmatpush3.bf16.msra.mxu0 %v483_v30  ;;  %3619 = vmatprep.mubr.msk.bf16.mxu0 %vm3982_vm0, %v3981_v4 }
  0x8c   : > { %3629 = vmatprep.subr.bf16.mxu0 %v3981_v4  ;;  %3637 = vmatprep.mubr.msk.bf16.mxu1 %vm3982_vm0, %v3981_v4 }
  0x8d   : > { %v653_v39 = vpop.permute.xlu0 %652  ;;  %v648_v46 = vpop.permute.xlu1 %647 }
  0x8e   : > { %v658_v10 = vsel %vm383_vm3, %v653_v39, 0 }
  0x8f   : > { %3636 = vmatpush3.bf16.msra.mxu1 %v658_v10 }
  0x90   : > { %3647 = vmatprep.subr.bf16.mxu1 %v3981_v4 }
  0x91   : > { %v730_v54 = vpop.permute.xlu0 %729  ;;  %v725_v62 = vpop.permute.xlu1 %724 }
  0x92   : > { %3620 = vmatmul.mubr.msk.bf16.vlgmr.msra.gmra.mxu0 %vm427_vm2, %v4060_v8  ;;  %3638 = vmatmul.mubr.msk.bf16.vlgmr.msra.gmra.mxu1 %vm379_vm4, %v648_v46  ;;  %v735_v20 = vsel %vm383_vm3, %v730_v54, 0 }
  0x93   : > { %3630 = vmatpush3.bf16.msra.mxu0 %v596_v47  ;;  %3631 = vmatprep.mubr.msk.bf16.mxu0 %vm3982_vm0, %v3981_v4 }
  0x94   : > { %3641 = vmatprep.subr.bf16.mxu0 %v3981_v4  ;;  %3648 = vmatpush3.bf16.msra.mxu1 %v781_v55 }
  0x95   : > { %3649 = vmatprep.mubr.msk.bf16.mxu1 %vm3982_vm0, %v3981_v4  ;;  %3659 = vmatprep.subr.bf16.mxu1 %v3981_v4  ;;  %v887_v16 = vpop.permute.xlu0 %886  ;;  %v882_v9 = vpop.permute.xlu1 %881 }
  0x96   : > { %v892_v8 = vsel %vm383_vm3, %v887_v16, 0  ;;  %v1849_v16 = vsel %vm431_vm1, %v4223_v56, 0 }
  0x99   : > { %v999_v63 = vpop.permute.xlu0 %998 }
  0x9a   : > { %3632 = vmatmul.mubr.msk.bf16.vlgmr.msra.gmra.mxu0 %vm427_vm2, %v4084_v17  ;;  %3650 = vmatmul.mubr.msk.bf16.vlgmr.msra.gmra.mxu1 %vm427_vm2, %v4099_v21  ;;  %v830_v17 = vsel %vm431_vm1, %v4111_v24, 0  ;;  %v1004_v11 = vsel %vm383_vm3, %v999_v63, 0  ;;  %v994_v21 = vpop.permute.xlu1 %993  ;;  %v942_v24 = vsel %vm431_vm1, %v4125_v28, 0 }
  0x9b   : > { %3642 = vmatpush3.bf16.msra.mxu0 %v735_v20  ;;  %3643 = vmatprep.mubr.msk.bf16.mxu0 %vm3982_vm0, %v3981_v4 }
  0x9c   : > { %3653 = vmatprep.subr.bf16.mxu0 %v3981_v4  ;;  %3660 = vmatpush3.bf16.msra.mxu1 %v892_v8 }
  0x9d   : > { %3661 = vmatprep.mubr.msk.bf16.mxu1 %vm3982_vm0, %v3981_v4  ;;  %3671 = vmatprep.subr.bf16.mxu1 %v3981_v4  ;;  %v1086_v14 = vpop.permute.xlu0 %1085 }
  0x9e   : > { %v1091_v32 = vsel %vm383_vm3, %v1086_v14, 0  ;;  %v1081_v22 = vpop.permute.xlu1 %1080 }
  0xa1   : > { %v1243_v28 = vpop.permute.xlu0 %1242 }
  0xa2   : > { %3644 = vmatmul.mubr.msk.bf16.vlgmr.msra.gmra.mxu0 %vm379_vm4, %v725_v62  ;;  %3662 = vmatmul.mubr.msk.bf16.vlgmr.msra.gmra.mxu1 %vm379_vm4, %v882_v9  ;;  %v1238_v30 = vpop.permute.xlu1 %1237 }
  0xa3   : > { %3654 = vmatpush3.bf16.msra.mxu0 %v830_v17  ;;  %3655 = vmatprep.mubr.msk.bf16.mxu0 %vm3982_vm0, %v3981_v4 }
  0xa4   : > { %3665 = vmatprep.subr.bf16.mxu0 %v3981_v4  ;;  %3672 = vmatpush3.bf16.msra.mxu1 %v1004_v11 }
  0xa5   : > { %3673 = vmatprep.mubr.msk.bf16.mxu1 %vm3982_vm0, %v3981_v4  ;;  %3683 = vmatprep.subr.bf16.mxu1 %v3981_v4  ;;  %v1355_v23 = vpop.permute.xlu0 %1354 }
  0xa6   : > { %v1360_v31 = vsel %vm383_vm3, %v1355_v23, 0 }
  0xa9   : > { %v1442_v39 = vpop.permute.xlu0 %1441 }
  0xaa   : > { %3656 = vmatmul.mubr.msk.bf16.vlgmr.msra.gmra.mxu0 %vm427_vm2, %v4116_v25  ;;  %3674 = vmatmul.mubr.msk.bf16.vlgmr.msra.gmra.mxu1 %vm379_vm4, %v994_v21  ;;  %v1248_v25 = vsel %vm383_vm3, %v1243_v28, 0  ;;  %v1447_v44 = vsel %vm383_vm3, %v1442_v39, 0 }
  0xab   : > { %3666 = vmatpush3.bf16.msra.mxu0 %v942_v24  ;;  %3667 = vmatprep.mubr.msk.bf16.mxu0 %vm3982_vm0, %v3981_v4  ;;  %v2205_v24 = vsel %vm431_vm1, %v4265_v5, 0 }
  0xac   : > { %3677 = vmatprep.subr.bf16.mxu0 %v3981_v4  ;;  %3684 = vmatpush3.bf16.msra.mxu1 %v1137_v15 }
  0xad   : > { %3685 = vmatprep.mubr.msk.bf16.mxu1 %vm3982_vm0, %v3981_v4  ;;  %3695 = vmatprep.subr.bf16.mxu1 %v3981_v4 }
  0xb2   : > { %3668 = vmatmul.mubr.msk.bf16.vlgmr.msra.gmra.mxu0 %vm427_vm2, %v4130_v29  ;;  %3686 = vmatmul.mubr.msk.bf16.vlgmr.msra.gmra.mxu1 %vm427_vm2, %v4144_v33  ;;  %v1186_v29 = vsel %vm431_vm1, %v4153_v36, 0  ;;  %v1350_v33 = vpop.permute.xlu1 %1349  ;;  %v1298_v36 = vsel %vm431_vm1, %v4167_v40, 0  ;;  %v1599_v40 = vpop.permute.xlu0 %1598 }
  0xb3   : > { %3678 = vmatpush3.bf16.msra.mxu0 %v1091_v32  ;;  %3679 = vmatprep.mubr.msk.bf16.mxu0 %vm3982_vm0, %v3981_v4 }
  0xb4   : > { %3689 = vmatprep.subr.bf16.mxu0 %v3981_v4  ;;  %3696 = vmatpush3.bf16.msra.mxu1 %v1248_v25  ;;  %v2561_v25 = vsel %vm431_vm1, %v4307_v26, 0 }
  0xb5   : > { %3697 = vmatprep.mubr.msk.bf16.mxu1 %vm3982_vm0, %v3981_v4  ;;  %3707 = vmatprep.subr.bf16.mxu1 %v3981_v4 }
  0xb6   : > { %v1437_v10 = vpop.permute.xlu1 %1436  ;;  %v1711_v46 = vpop.permute.xlu0 %1710 }
  0xba   : > { %3680 = vmatmul.mubr.msk.bf16.vlgmr.msra.gmra.mxu0 %vm379_vm4, %v1081_v22  ;;  %3698 = vmatmul.mubr.msk.bf16.vlgmr.msra.gmra.mxu1 %vm379_vm4, %v1238_v30  ;;  %v1594_v47 = vpop.permute.xlu1 %1593  ;;  %v1798_v20 = vpop.permute.xlu0 %1797 }
  0xbb   : > { %3690 = vmatpush3.bf16.msra.mxu0 %v1186_v29  ;;  %3691 = vmatprep.mubr.msk.bf16.mxu0 %vm3982_vm0, %v3981_v4 }
  0xbc   : > { %3701 = vmatprep.subr.bf16.mxu0 %v3981_v4  ;;  %3708 = vmatpush3.bf16.msra.mxu1 %v1360_v31 }
  0xbd   : > { %3709 = vmatprep.mubr.msk.bf16.mxu1 %vm3982_vm0, %v3981_v4  ;;  %3719 = vmatprep.subr.bf16.mxu1 %v3981_v4 }
  0xbe   : > { %v1706_v54 = vpop.permute.xlu1 %1705  ;;  %v1955_v56 = vpop.permute.xlu0 %1954 }
  0xbf   : > { %v1960_v63 = vsel %vm383_vm3, %v1955_v56, 0 }
  0xc2   : > { %3692 = vmatmul.mubr.msk.bf16.vlgmr.msra.gmra.mxu0 %vm427_vm2, %v4158_v37  ;;  %3710 = vmatmul.mubr.msk.bf16.vlgmr.msra.gmra.mxu1 %vm379_vm4, %v1350_v33  ;;  %v1604_v37 = vsel %vm383_vm3, %v1599_v40, 0  ;;  %v1793_v9 = vpop.permute.xlu1 %1792  ;;  %v2067_v17 = vpop.permute.xlu0 %2066 }
  0xc3   : > { %3702 = vmatpush3.bf16.msra.mxu0 %v1298_v36  ;;  %3703 = vmatprep.mubr.msk.bf16.mxu0 %vm3982_vm0, %v3981_v4  ;;  %v2917_v36 = vsel %vm431_vm1, %v4349_v50, 0 }
  0xc4   : > { %3713 = vmatprep.subr.bf16.mxu0 %v3981_v4  ;;  %3720 = vmatpush3.bf16.msra.mxu1 %v1493_v38 }
  0xc5   : > { %3721 = vmatprep.mubr.msk.bf16.mxu1 %vm3982_vm0, %v3981_v4  ;;  %3731 = vmatprep.subr.bf16.mxu1 %v3981_v4 }
  0xc6   : > { %v1950_v11 = vpop.permute.xlu1 %1949  ;;  %v2154_v14 = vpop.permute.xlu0 %2153 }
  0xc7   : > { %v2159_v5 = vsel %vm383_vm3, %v2154_v14, 0 }
  0xca   : > { %3704 = vmatmul.mubr.msk.bf16.vlgmr.msra.gmra.mxu0 %vm427_vm2, %v4172_v41  ;;  %3722 = vmatmul.mubr.msk.bf16.vlgmr.msra.gmra.mxu1 %vm427_vm2, %v4186_v45  ;;  %v1542_v41 = vsel %vm431_vm1, %v4195_v48, 0  ;;  %v1716_v45 = vsel %vm383_vm3, %v1711_v46, 0  ;;  %v1654_v48 = vsel %vm431_vm1, %v4209_v52, 0  ;;  %v2062_v21 = vpop.permute.xlu1 %2061 }
  0xcb   : > { %3714 = vmatpush3.bf16.msra.mxu0 %v1447_v44  ;;  %3715 = vmatprep.mubr.msk.bf16.mxu0 %vm3982_vm0, %v3981_v4 }
  0xcc   : > { %3725 = vmatprep.subr.bf16.mxu0 %v3981_v4  ;;  %3732 = vmatpush3.bf16.msra.mxu1 %v1604_v37 }
  0xcd   : > { %3733 = vmatprep.mubr.msk.bf16.mxu1 %vm3982_vm0, %v3981_v4  ;;  %3743 = vmatprep.subr.bf16.mxu1 %v3981_v4 }
  0xce   : > { %v2149_v15 = vpop.permute.xlu1 %2148 }
  0xd2   : > { %3716 = vmatmul.mubr.msk.bf16.vlgmr.msra.gmra.mxu0 %vm379_vm4, %v1437_v10  ;;  %3734 = vmatmul.mubr.msk.bf16.vlgmr.msra.gmra.mxu1 %vm379_vm4, %v1594_v47  ;;  %v2306_v32 = vpop.permute.xlu1 %2305 }
  0xd3   : > { %3726 = vmatpush3.bf16.msra.mxu0 %v1542_v41  ;;  %3727 = vmatprep.mubr.msk.bf16.mxu0 %vm3982_vm0, %v3981_v4 }
  0xd4   : > { %3737 = vmatprep.subr.bf16.mxu0 %v3981_v4  ;;  %3744 = vmatpush3.bf16.msra.mxu1 %v1716_v45 }
  0xd5   : > { %3745 = vmatprep.mubr.msk.bf16.mxu1 %vm3982_vm0, %v3981_v4  ;;  %3755 = vmatprep.subr.bf16.mxu1 %v3981_v4  ;;  %v4521_v55 = vpop.f32.mrf.mxu1 }
  0xd6   : > { %v2418_v22 = vpop.permute.xlu1 %2417 }
  0xd7   : > { %v3615_v62 = vpop.f32.mrf.mxu1 }
  0xd9   : > { %v472_v52 = vpop.f32.mrf.mxu1 }
  0xda   : > { %3728 = vmatmul.mubr.msk.bf16.vlgmr.msra.gmra.mxu0 %vm427_vm2, %v4200_v49  ;;  %3746 = vmatmul.mubr.msk.bf16.vlgmr.msra.gmra.mxu1 %vm379_vm4, %v1706_v54  ;;  %v1803_v49 = vsel %vm383_vm3, %v1798_v20, 0  ;;  %v2505_v30 = vpop.permute.xlu1 %2504 }
  0xdb   : > { %3738 = vmatpush3.bf16.msra.mxu0 %v1654_v48  ;;  %3739 = vmatprep.mubr.msk.bf16.mxu0 %vm3982_vm0, %v3981_v4  ;;  %v3616_v8 = vpop.f32.mrf.mxu1 }
  0xdc   : > { %3749 = vmatprep.subr.bf16.mxu0 %v3981_v4  ;;  %3756 = vmatpush3.bf16.msra.mxu1 %v1849_v16 }
  0xdd   : > { %3757 = vmatprep.mubr.msk.bf16.mxu1 %vm3982_vm0, %v3981_v4  ;;  %3767 = vmatprep.subr.bf16.mxu1 %v3981_v4 }
  0xde   : > { %v2662_v31 = vpop.permute.xlu1 %2661 }
  0xe2   : > { %3740 = vmatmul.mubr.msk.bf16.vlgmr.msra.gmra.mxu0 %vm427_vm2, %v4214_v53  ;;  %3758 = vmatmul.mubr.msk.bf16.vlgmr.msra.gmra.mxu1 %vm427_vm2, %v4228_v57  ;;  %v1898_v53 = vsel %vm431_vm1, %v4237_v60, 0  ;;  %v2072_v57 = vsel %vm383_vm3, %v2067_v17, 0  ;;  %v2010_v60 = vsel %vm431_vm1, %v4251_v0, 0  ;;  %v2311_v0 = vpop.permute.xlu0 %2310  ;;  %v2774_v33 = vpop.permute.xlu1 %2773 }
  0xe3   : > { %3750 = vmatpush3.bf16.msra.mxu0 %v1803_v49  ;;  %3751 = vmatprep.mubr.msk.bf16.mxu0 %vm3982_vm0, %v3981_v4 }
  0xe4   : > { %3761 = vmatprep.subr.bf16.mxu0 %v3981_v4  ;;  %3768 = vmatpush3.bf16.msra.mxu1 %v1960_v63 }
  0xe5   : > { %3769 = vmatprep.mubr.msk.bf16.mxu1 %vm3982_vm0, %v3981_v4  ;;  %3779 = vmatprep.subr.bf16.mxu1 %v3981_v4 }
  0xe6   : > { %v2423_v28 = vpop.permute.xlu0 %2422  ;;  %v2861_v39 = vpop.permute.xlu1 %2860 }
  0xea   : > { %3752 = vmatmul.mubr.msk.bf16.vlgmr.msra.gmra.mxu0 %vm379_vm4, %v1793_v9  ;;  %3770 = vmatmul.mubr.msk.bf16.vlgmr.msra.gmra.mxu1 %vm379_vm4, %v1950_v11  ;;  %v2510_v23 = vpop.permute.xlu0 %2509  ;;  %v3018_v44 = vpop.permute.xlu1 %3017 }
  0xeb   : > { %3762 = vmatpush3.bf16.msra.mxu0 %v1898_v53  ;;  %3763 = vmatprep.mubr.msk.bf16.mxu0 %vm3982_vm0, %v3981_v4  ;;  %v2515_v26 = vsel %vm383_vm3, %v2510_v23, 0 }
  0xec   : > { %3773 = vmatprep.subr.bf16.mxu0 %v3981_v4  ;;  %3780 = vmatpush3.bf16.msra.mxu1 %v2072_v57 }
  0xed   : > { %3781 = vmatprep.mubr.msk.bf16.mxu1 %vm3982_vm0, %v3981_v4  ;;  %3791 = vmatprep.subr.bf16.mxu1 %v3981_v4 }
  0xee   : > { %v3129_v37 = vpop.permute.xlu1 %3128 }
  0xf2   : > { %3764 = vmatmul.mubr.msk.bf16.vlgmr.msra.gmra.mxu0 %vm427_vm2, %v4242_v61  ;;  %3782 = vmatmul.mubr.msk.bf16.vlgmr.msra.gmra.mxu1 %vm379_vm4, %v2062_v21  ;;  %v2316_v61 = vsel %vm383_vm3, %v2311_v0, 0 }
  0xf3   : > { %3774 = vmatpush3.bf16.msra.mxu0 %v2010_v60  ;;  %3775 = vmatprep.mubr.msk.bf16.mxu0 %vm3982_vm0, %v3981_v4 }
  0xf4   : > { %3785 = vmatprep.subr.bf16.mxu0 %v3981_v4  ;;  %3792 = vmatpush3.bf16.msra.mxu1 %v2205_v24 }
  0xf5   : > { %3793 = vmatprep.mubr.msk.bf16.mxu1 %vm3982_vm0, %v3981_v4  ;;  %3803 = vmatprep.subr.bf16.mxu1 %v3981_v4 }
  0xfa   : > { %3776 = vmatmul.mubr.msk.bf16.vlgmr.msra.gmra.mxu0 %vm427_vm2, %v4256_v1  ;;  %3794 = vmatmul.mubr.msk.bf16.vlgmr.msra.gmra.mxu1 %vm427_vm2, %v4270_v6  ;;  %v2254_v1 = vsel %vm431_vm1, %v4279_v12, 0  ;;  %v2428_v6 = vsel %vm383_vm3, %v2423_v28, 0  ;;  %v2366_v12 = vsel %vm431_vm1, %v4293_v18, 0  ;;  %v2667_v18 = vpop.permute.xlu0 %2666 }
  0xfb   : > { %3786 = vmatpush3.bf16.msra.mxu0 %v2159_v5  ;;  %3787 = vmatprep.mubr.msk.bf16.mxu0 %vm3982_vm0, %v3981_v4 }
  0xfc   : > { %3797 = vmatprep.subr.bf16.mxu0 %v3981_v4  ;;  %3804 = vmatpush3.bf16.msra.mxu1 %v2316_v61 }
  0xfd   : > { %3805 = vmatprep.mubr.msk.bf16.mxu1 %vm3982_vm0, %v3981_v4  ;;  %3815 = vmatprep.subr.bf16.mxu1 %v3981_v4 }
  0xfe   : > { %v2779_v29 = vpop.permute.xlu0 %2778 }
 0x102   : > { %3788 = vmatmul.mubr.msk.bf16.vlgmr.msra.gmra.mxu0 %vm379_vm4, %v2149_v15  ;;  %3806 = vmatmul.mubr.msk.bf16.vlgmr.msra.gmra.mxu1 %vm379_vm4, %v2306_v32  ;;  %v2866_v38 = vpop.permute.xlu0 %2865 }
 0x103   : > { %3798 = vmatpush3.bf16.msra.mxu0 %v2254_v1  ;;  %3799 = vmatprep.mubr.msk.bf16.mxu0 %vm3982_vm0, %v3981_v4  ;;  %v2871_v50 = vsel %vm383_vm3, %v2866_v38, 0 }
 0x104   : > { %3809 = vmatprep.subr.bf16.mxu0 %v3981_v4  ;;  %3816 = vmatpush3.bf16.msra.mxu1 %v2428_v6 }
 0x105   : > { %3817 = vmatprep.mubr.msk.bf16.mxu1 %vm3982_vm0, %v3981_v4  ;;  %3827 = vmatprep.subr.bf16.mxu1 %v3981_v4 }
 0x10a   : > { %3800 = vmatmul.mubr.msk.bf16.vlgmr.msra.gmra.mxu0 %vm427_vm2, %v4284_v13  ;;  %3818 = vmatmul.mubr.msk.bf16.vlgmr.msra.gmra.mxu1 %vm379_vm4, %v2418_v22  ;;  %v2672_v13 = vsel %vm383_vm3, %v2667_v18, 0 }
 0x10b   : > { %3810 = vmatpush3.bf16.msra.mxu0 %v2366_v12  ;;  %3811 = vmatprep.mubr.msk.bf16.mxu0 %vm3982_vm0, %v3981_v4 }
 0x10c   : > { %3821 = vmatprep.subr.bf16.mxu0 %v3981_v4  ;;  %3828 = vmatpush3.bf16.msra.mxu1 %v2561_v25 }
 0x10d   : > { %3829 = vmatprep.mubr.msk.bf16.mxu1 %vm3982_vm0, %v3981_v4  ;;  %3839 = vmatprep.subr.bf16.mxu1 %v3981_v4 }
 0x112   : > { %3812 = vmatmul.mubr.msk.bf16.vlgmr.msra.gmra.mxu0 %vm427_vm2, %v4298_v19  ;;  %3830 = vmatmul.mubr.msk.bf16.vlgmr.msra.gmra.mxu1 %vm427_vm2, %v4312_v27  ;;  %v2610_v19 = vsel %vm431_vm1, %v4321_v34, 0  ;;  %v2784_v27 = vsel %vm383_vm3, %v2779_v29, 0  ;;  %v2722_v34 = vsel %vm431_vm1, %v4335_v42, 0  ;;  %v3023_v42 = vpop.permute.xlu0 %3022 }
 0x113   : > { %3822 = vmatpush3.bf16.msra.mxu0 %v2515_v26  ;;  %3823 = vmatprep.mubr.msk.bf16.mxu0 %vm3982_vm0, %v3981_v4 }
 0x114   : > { %3833 = vmatprep.subr.bf16.mxu0 %v3981_v4  ;;  %3840 = vmatpush3.bf16.msra.mxu1 %v2672_v13 }
 0x115   : > { %3841 = vmatprep.mubr.msk.bf16.mxu1 %vm3982_vm0, %v3981_v4  ;;  %3851 = vmatprep.subr.bf16.mxu1 %v3981_v4 }
 0x116   : > { %v3134_v40 = vpop.permute.xlu0 %3133 }
 0x11a   : > { %3824 = vmatmul.mubr.msk.bf16.vlgmr.msra.gmra.mxu0 %vm379_vm4, %v2505_v30  ;;  %3842 = vmatmul.mubr.msk.bf16.vlgmr.msra.gmra.mxu1 %vm379_vm4, %v2662_v31 }
 0x11b   : > { %3834 = vmatpush3.bf16.msra.mxu0 %v2610_v19  ;;  %3835 = vmatprep.mubr.msk.bf16.mxu0 %vm3982_vm0, %v3981_v4 }
 0x11c   : > { %3845 = vmatprep.subr.bf16.mxu0 %v3981_v4  ;;  %3852 = vmatpush3.bf16.msra.mxu1 %v2784_v27 }
 0x11d   : > { %3853 = vmatprep.mubr.msk.bf16.mxu1 %vm3982_vm0, %v3981_v4  ;;  %3863 = vmatprep.subr.bf16.mxu1 %v3981_v4 }
 0x122   : > { %3836 = vmatmul.mubr.msk.bf16.vlgmr.msra.gmra.mxu0 %vm427_vm2, %v4326_v35  ;;  %3854 = vmatmul.mubr.msk.bf16.vlgmr.msra.gmra.mxu1 %vm379_vm4, %v2774_v33  ;;  %v3028_v35 = vsel %vm383_vm3, %v3023_v42, 0 }
 0x123   : > { %3846 = vmatpush3.bf16.msra.mxu0 %v2722_v34  ;;  %3847 = vmatprep.mubr.msk.bf16.mxu0 %vm3982_vm0, %v3981_v4 }
 0x124   : > { %3857 = vmatprep.subr.bf16.mxu0 %v3981_v4  ;;  %3864 = vmatpush3.bf16.msra.mxu1 %v2917_v36 }
 0x125   : > { %3865 = vmatprep.mubr.msk.bf16.mxu1 %vm3982_vm0, %v3981_v4  ;;  %3875 = vmatprep.subr.bf16.mxu1 %v3981_v4 }
 0x12a   : > { %3848 = vmatmul.mubr.msk.bf16.vlgmr.msra.gmra.mxu0 %vm427_vm2, %v4340_v43  ;;  %3866 = vmatmul.mubr.msk.bf16.vlgmr.msra.gmra.mxu1 %vm427_vm2, %v4354_v51  ;;  %v2966_v43 = vsel %vm431_vm1, %v4365_v58, 0  ;;  %v3139_v51 = vsel %vm383_vm3, %v3134_v40, 0  ;;  %v3077_v58 = vsel %vm431_vm1, %v4381_v2, 0 }
 0x12b   : > { %3858 = vmatpush3.bf16.msra.mxu0 %v2871_v50  ;;  %3859 = vmatprep.mubr.msk.bf16.mxu0 %vm3982_vm0, %v3981_v4 }
 0x12c   : > { %3869 = vmatprep.subr.bf16.mxu0 %v3981_v4  ;;  %3876 = vmatpush3.bf16.msra.mxu1 %v3028_v35 }
 0x12d   : > { %3877 = vmatprep.mubr.msk.bf16.mxu1 %vm3982_vm0, %v3981_v4  ;;  %3887 = vmatprep.subr.bf16.mxu1 %v3981_v4 }
 0x132   : > { %3860 = vmatmul.mubr.msk.bf16.vlgmr.msra.gmra.mxu0 %vm379_vm4, %v2861_v39  ;;  %3878 = vmatmul.mubr.msk.bf16.vlgmr.msra.gmra.mxu1 %vm379_vm4, %v3018_v44 }
 0x133   : > { %3870 = vmatpush3.bf16.msra.mxu0 %v2966_v43  ;;  %3871 = vmatprep.mubr.msk.bf16.mxu0 %vm3982_vm0, %v3981_v4 }
 0x134   : > { %3881 = vmatprep.subr.bf16.mxu0 %v3981_v4  ;;  %3888 = vmatpush3.bf16.msra.mxu1 %v3139_v51 }
 0x135   : > { %3889 = vmatprep.mubr.msk.bf16.mxu1 %vm3982_vm0, %v3981_v4 }
 0x13a   : > { %3872 = vmatmul.mubr.msk.bf16.vlgmr.msra.gmra.mxu0 %vm427_vm2, %v4370_v59  ;;  %3890 = vmatmul.mubr.msk.bf16.vlgmr.msra.gmra.mxu1 %vm379_vm4, %v3129_v37 }
 0x13b   : > { %3882 = vmatpush3.bf16.msra.mxu0 %v3077_v58  ;;  %3883 = vmatprep.mubr.msk.bf16.mxu0 %vm3982_vm0, %v3981_v4 }
 0x142   : > { %3884 = vmatmul.mubr.msk.bf16.vlgmr.msra.gmra.mxu0 %vm427_vm2, %v4386_v3 }
 0x14a   : > { %v421_v10 = vpop.f32.mrf.mxu0  ;;  %v581_v46 = vpop.f32.mrf.mxu1 }
 0x14b   : > { %v470_v20 = vadd.f32 %v4521_v55, %v421_v10 }
 0x14c   : > { %v3609_v47 = vpop.f32.mrf.mxu0  ;;  %v3627_v41 = vpop.f32.mrf.mxu1 }
 0x14e   : > { %v424_v45 = vpop.f32.mrf.mxu0  ;;  %v584_v54 = vpop.f32.mrf.mxu1 }
 0x150   : > { %v3610_v48 = vpop.f32.mrf.mxu0  ;;  %v3628_v2 = vpop.f32.mrf.mxu1 }
 0x152   : > { %v519_v16 = vpop.f32.mrf.mxu0  ;;  %v694_v59 = vpop.f32.mrf.mxu1 }
 0x153   : > { %v525_v56 = vadd.f32 %v519_v16, %v470_v20 }
 0x154   : > { %v3621_v62 = vpop.f32.mrf.mxu0  ;;  %v3639_v52 = vpop.f32.mrf.mxu1 }
 0x155   : > { %v587_v63 = vadd.f32 %v581_v46, %v525_v56 }
 0x156   : > { %v522_v4 = vpop.f32.mrf.mxu0  ;;  %v697_v8 = vpop.f32.mrf.mxu1 }
 0x158   : > { %v3622_v49 = vpop.f32.mrf.mxu0  ;;  %v3640_v3 = vpop.f32.mrf.mxu1 }
 0x15a   : > { %v632_v9 = vpop.f32.mrf.mxu0  ;;  %v817_v17 = vpop.f32.mrf.mxu1 }
 0x15b   : > { %v638_v11 = vadd.f32 %v632_v9, %v587_v63 }
 0x15c   : > { %v3633_v53 = vpop.f32.mrf.mxu0  ;;  %v3651_v57 = vpop.f32.mrf.mxu1 }
 0x15d   : > { %v700_v21 = vadd.f32 %v694_v59, %v638_v11 }
 0x15e   : > { %v635_v60 = vpop.f32.mrf.mxu0  ;;  %v820_v24 = vpop.f32.mrf.mxu1 }
 0x15f   : > { %v701_v55 = vpack.c.bf16 %v700_v21, %v700_v21  ;;  %v705_v14 = vsel %vm704_vm5, %v700_v21, 0.0  ;;  %v709_v0 = vmul.f32 %v700_v21, %v700_v21 }
 0x160   : > { %v3634_v5 = vpop.f32.mrf.mxu0  ;;  %706 = vadd.xlane.f32.xlu0 %v705_v14  ;;  %v3652_v61 = vpop.f32.mrf.mxu1 }
 0x161   : > { %v710_v15 = vsel %vm704_vm5, %v709_v0, 0.0  ;;  %703 = vst.msk [vmem:[%s4678_s26] sm:$0x3] %vm702_vm6, %v701_v55 }
 0x162   : > { %711 = vadd.xlane.f32.xlu1 %v710_v15  ;;  %v771_v28 = vpop.f32.mrf.mxu0  ;;  %v928_v32 = vpop.f32.mrf.mxu1 }
 0x163   : > { %v818_v13 = vadd.f32 %v817_v17, %v771_v28 }
 0x164   : > { %v3645_v1 = vpop.f32.mrf.mxu0  ;;  %v3663_v6 = vpop.f32.mrf.mxu1 }
 0x166   : > { %v774_v22 = vpop.f32.mrf.mxu0  ;;  %v931_v12 = vpop.f32.mrf.mxu1 }
 0x168   : > { %v3646_v25 = vpop.f32.mrf.mxu0  ;;  %v3664_v23 = vpop.f32.mrf.mxu1 }
 0x16a   : > { %v866_v18 = vpop.f32.mrf.mxu0  ;;  %v1040_v26 = vpop.f32.mrf.mxu1 }
 0x16b   : > { %v872_v31 = vadd.f32 %v866_v18, %v818_v13 }
 0x16c   : > { %v3657_v30 = vpop.f32.mrf.mxu0  ;;  %v3675_v29 = vpop.f32.mrf.mxu1 }
 0x16d   : > { %v934_v36 = vadd.f32 %v928_v32, %v872_v31 }
 0x16e   : > { %v869_v19 = vpop.f32.mrf.mxu0  ;;  %v1043_v27 = vpop.f32.mrf.mxu1 }
 0x170   : > { %v3658_v33 = vpop.f32.mrf.mxu0  ;;  %v3676_v34 = vpop.f32.mrf.mxu1 }
 0x172   : > { %v978_v38 = vpop.f32.mrf.mxu0  ;;  %v1173_v42 = vpop.f32.mrf.mxu1 }
 0x173   : > { %v984_v50 = vadd.f32 %v978_v38, %v934_v36 }
 0x174   : > { %v3669_v35 = vpop.f32.mrf.mxu0  ;;  %v3687_v39 = vpop.f32.mrf.mxu1 }
 0x175   : > { %v1046_v40 = vadd.f32 %v1040_v26, %v984_v50 }
 0x176   : > { %v981_v44 = vpop.f32.mrf.mxu0  ;;  %v1176_v43 = vpop.f32.mrf.mxu1 }
 0x177   : > { %v1061_v51 = vsel %vm704_vm5, %v1046_v40, 0.0  ;;  %v1047_v37 = vpack.c.bf16 %v1046_v40, %v1046_v40  ;;  %v1065_v58 = vmul.f32 %v1046_v40, %v1046_v40 }
 0x178   : > { %v3670_v10 = vpop.f32.mrf.mxu0  ;;  %1062 = vadd.xlane.f32.xlu1 %v1061_v51  ;;  %v3688_v46 = vpop.f32.mrf.mxu1 }
 0x179   : > { %v1055_v47 = vrot.slane %v1047_v37, %v4055_v7  ;;  %v1066_v54 = vsel %vm704_vm5, %v1065_v58, 0.0 }
 0x17a   : > { %v1127_v41 = vpop.f32.mrf.mxu0  ;;  %v1284_v45 = vpop.f32.mrf.mxu1 }
 0x17b   : > { %1056 = vrot.lane.b32.xlu0 %v1055_v47, %s3985_s27  ;;  %v1174_v4 = vadd.f32 %v1173_v42, %v1127_v41 }
 0x17c   : > { %1067 = vadd.xlane.f32.xlu1 %v1066_v54  ;;  %v3681_v48 = vpop.f32.mrf.mxu0  ;;  %v3699_v2 = vpop.f32.mrf.mxu1 }
 0x17e   : > { %v1130_v16 = vpop.f32.mrf.mxu0  ;;  %v1287_v59 = vpop.f32.mrf.mxu1 }
 0x180   : > { %v3682_v20 = vpop.f32.mrf.mxu0  ;;  %v3700_v62 = vpop.f32.mrf.mxu1 }
 0x182   : > { %v1222_v52 = vpop.f32.mrf.mxu0  ;;  %v1396_v56 = vpop.f32.mrf.mxu1 }
 0x183   : > { %v1228_v3 = vadd.f32 %v1222_v52, %v1174_v4 }
 0x184   : > { %v3693_v8 = vpop.f32.mrf.mxu0  ;;  %v3711_v49 = vpop.f32.mrf.mxu1 }
 0x185   : > { %v1290_v53 = vadd.f32 %v1284_v45, %v1228_v3 }
 0x186   : > { %v1225_v63 = vpop.f32.mrf.mxu0  ;;  %v1399_v9 = vpop.f32.mrf.mxu1 }
 0x188   : > { %v3694_v17 = vpop.f32.mrf.mxu0  ;;  %v3712_v11 = vpop.f32.mrf.mxu1 }
 0x18a   : > { %v1334_v57 = vpop.f32.mrf.mxu0  ;;  %v1529_v21 = vpop.f32.mrf.mxu1 }
 0x18b   : > { %v1340_v60 = vadd.f32 %v1334_v57, %v1290_v53 }
 0x18c   : > { %v3705_v24 = vpop.f32.mrf.mxu0  ;;  %v3723_v55 = vpop.f32.mrf.mxu1 }
 0x18d   : > { %v1402_v14 = vadd.f32 %v1396_v56, %v1340_v60 }
 0x18e   : > { %v1337_v0 = vpop.f32.mrf.mxu0  ;;  %v1532_v5 = vpop.f32.mrf.mxu1 }
 0x18f   : > { %v1421_v61 = vmul.f32 %v1402_v14, %v1402_v14  ;;  %v1417_v30 = vsel %vm704_vm5, %v1402_v14, 0.0  ;;  %v1403_v34 = vpack.c.bf16 %v1402_v14, %v1402_v14 }
 0x190   : > { %v3706_v15 = vpop.f32.mrf.mxu0  ;;  %v3724_v28 = vpop.f32.mrf.mxu1 }
 0x191   : > { %v1422_v32 = vsel %vm704_vm5, %v1421_v61, 0.0  ;;  %v1411_v39 = vrot.slane %v1403_v34, %v4055_v7 }
 0x192   : > { %1423 = vadd.xlane.f32.xlu1 %v1422_v32  ;;  %v1483_v1 = vpop.f32.mrf.mxu0  ;;  %v1640_v6 = vpop.f32.mrf.mxu1 }
 0x193   : > { %v1530_v13 = vadd.f32 %v1529_v21, %v1483_v1 }
 0x194   : > { %v3717_v22 = vpop.f32.mrf.mxu0  ;;  %v3735_v12 = vpop.f32.mrf.mxu1 }
 0x196   : > { %v1486_v25 = vpop.f32.mrf.mxu0  ;;  %v1643_v23 = vpop.f32.mrf.mxu1 }
 0x198   : > { %v3718_v18 = vpop.f32.mrf.mxu0  ;;  %v3736_v26 = vpop.f32.mrf.mxu1 }
 0x19a   : > { %1418 = vadd.xlane.f32.xlu0 %v1417_v30  ;;  %v1578_v29 = vpop.f32.mrf.mxu0  ;;  %v1752_v31 = vpop.f32.mrf.mxu1 }
 0x19b   : > { %v1584_v33 = vadd.f32 %v1578_v29, %v1530_v13 }
 0x19c   : > { %v3729_v19 = vpop.f32.mrf.mxu0  ;;  %v3747_v27 = vpop.f32.mrf.mxu1 }
 0x19d   : > { %v1646_v35 = vadd.f32 %v1640_v6, %v1584_v33 }
 0x19e   : > { %v1581_v36 = vpop.f32.mrf.mxu0  ;;  %v1755_v38 = vpop.f32.mrf.mxu1 }
 0x1a0   : > { %v3730_v42 = vpop.f32.mrf.mxu0  ;;  %v3748_v50 = vpop.f32.mrf.mxu1 }
 0x1a2   : > { %v1690_v40 = vpop.f32.mrf.mxu0  ;;  %v1885_v44 = vpop.f32.mrf.mxu1 }
 0x1a3   : > { %v1696_v43 = vadd.f32 %v1690_v40, %v1646_v35  ;;  %1412 = vrot.lane.b32.xlu1 %v1411_v39, %s3986_s28 }
 0x1a4   : > { %v3741_v51 = vpop.f32.mrf.mxu0  ;;  %v3759_v37 = vpop.f32.mrf.mxu1 }
 0x1a5   : > { %v1758_v58 = vadd.f32 %v1752_v31, %v1696_v43 }
 0x1a6   : > { %v1693_v10 = vpop.f32.mrf.mxu0  ;;  %v1888_v46 = vpop.f32.mrf.mxu1 }
 0x1a7   : > { %v1759_v45 = vpack.c.bf16 %v1758_v58, %v1758_v58  ;;  %v1773_v23 = vsel %vm704_vm5, %v1758_v58, 0.0  ;;  %v1777_v18 = vmul.f32 %v1758_v58, %v1758_v58 }
 0x1a8   : > { %v3742_v47 = vpop.f32.mrf.mxu0  ;;  %v3760_v41 = vpop.f32.mrf.mxu1 }
 0x1a9   : > { %v1767_v20 = vrot.slane %v1759_v45, %v4055_v7  ;;  %v1778_v19 = vsel %vm704_vm5, %v1777_v18, 0.0 }
 0x1aa   : > { %v1839_v54 = vpop.f32.mrf.mxu0  ;;  %v1996_v48 = vpop.f32.mrf.mxu1 }
 0x1ab   : > { %v1886_v17 = vadd.f32 %v1885_v44, %v1839_v54 }
 0x1ac   : > { %v3753_v2 = vpop.f32.mrf.mxu0  ;;  %v3771_v16 = vpop.f32.mrf.mxu1 }
 0x1ae   : > { %v1842_v59 = vpop.f32.mrf.mxu0  ;;  %v1999_v62 = vpop.f32.mrf.mxu1 }
 0x1b0   : > { %1768 = vrot.lane.b32.xlu0 %v1767_v20, %s3987_s29  ;;  %v3754_v52 = vpop.f32.mrf.mxu0  ;;  %v3772_v56 = vpop.f32.mrf.mxu1 }
 0x1b2   : > { %v1934_v4 = vpop.f32.mrf.mxu0  ;;  %v2108_v8 = vpop.f32.mrf.mxu1 }
 0x1b3   : > { %v1940_v60 = vadd.f32 %v1934_v4, %v1886_v17 }
 0x1b4   : > { %v3765_v49 = vpop.f32.mrf.mxu0  ;;  %v3783_v3 = vpop.f32.mrf.mxu1 }
 0x1b5   : > { %v2002_v5 = vadd.f32 %v1996_v48, %v1940_v60 }
 0x1b6   : > { %v1937_v63 = vpop.f32.mrf.mxu0  ;;  %v2111_v9 = vpop.f32.mrf.mxu1 }
 0x1b8   : > { %v3766_v11 = vpop.f32.mrf.mxu0  ;;  %v3784_v53 = vpop.f32.mrf.mxu1 }
 0x1ba   : > { %v2046_v57 = vpop.f32.mrf.mxu0  ;;  %v2241_v21 = vpop.f32.mrf.mxu1 }
 0x1bb   : > { %v2052_v28 = vadd.f32 %v2046_v57, %v2002_v5 }
 0x1bc   : > { %v3777_v24 = vpop.f32.mrf.mxu0  ;;  %v3795_v55 = vpop.f32.mrf.mxu1 }
 0x1bd   : > { %v2114_v12 = vadd.f32 %v2108_v8, %v2052_v28 }
 0x1be   : > { %v2049_v14 = vpop.f32.mrf.mxu0  ;;  %v2244_v0 = vpop.f32.mrf.mxu1 }
 0x1bf   : > { %v2133_v27 = vmul.f32 %v2114_v12, %v2114_v12  ;;  %v2129_v35 = vsel %vm704_vm5, %v2114_v12, 0.0  ;;  %v2115_v59 = vpack.c.bf16 %v2114_v12, %v2114_v12 }
 0x1c0   : > { %v3778_v61 = vpop.f32.mrf.mxu0  ;;  %v3796_v15 = vpop.f32.mrf.mxu1 }
 0x1c1   : > { %v2134_v50 = vsel %vm704_vm5, %v2133_v27, 0.0  ;;  %v2123_v8 = vrot.slane %v2115_v59, %v4055_v7 }
 0x1c2   : > { %v2195_v32 = vpop.f32.mrf.mxu0  ;;  %v2352_v1 = vpop.f32.mrf.mxu1 }
 0x1c3   : > { %v2242_v29 = vadd.f32 %v2241_v21, %v2195_v32 }
 0x1c4   : > { %v3789_v6 = vpop.f32.mrf.mxu0  ;;  %v3807_v22 = vpop.f32.mrf.mxu1 }
 0x1c6   : > { %v2198_v25 = vpop.f32.mrf.mxu0  ;;  %v2355_v26 = vpop.f32.mrf.mxu1 }
 0x1c7   : > { %1774 = vadd.xlane.f32.xlu1 %v1773_v23 }
 0x1c8   : > { %v3790_v13 = vpop.f32.mrf.mxu0  ;;  %v3808_v30 = vpop.f32.mrf.mxu1 }
 0x1ca   : > { %v2290_v31 = vpop.f32.mrf.mxu0  ;;  %v2464_v33 = vpop.f32.mrf.mxu1 }
 0x1cb   : > { %1779 = vadd.xlane.f32.xlu1 %v1778_v19  ;;  %v2296_v38 = vadd.f32 %v2290_v31, %v2242_v29 }
 0x1cc   : > { %v3801_v34 = vpop.f32.mrf.mxu0  ;;  %v3819_v36 = vpop.f32.mrf.mxu1 }
 0x1cd   : > { %v2358_v43 = vadd.f32 %v2352_v1, %v2296_v38 }
 0x1ce   : > { %v2293_v42 = vpop.f32.mrf.mxu0  ;;  %v2467_v39 = vpop.f32.mrf.mxu1 }
 0x1cf   : > { %2135 = vadd.xlane.f32.xlu1 %v2134_v50  ;;  %2130 = vadd.xlane.f32.xlu0 %v2129_v35 }
 0x1d0   : > { %v3802_v40 = vpop.f32.mrf.mxu0  ;;  %v3820_v44 = vpop.f32.mrf.mxu1 }
 0x1d2   : > { %v2402_v51 = vpop.f32.mrf.mxu0  ;;  %v2597_v37 = vpop.f32.mrf.mxu1 }
 0x1d3   : > { %v2408_v58 = vadd.f32 %v2402_v51, %v2358_v43 }
 0x1d4   : > { %v3813_v10 = vpop.f32.mrf.mxu0  ;;  %v3831_v46 = vpop.f32.mrf.mxu1 }
 0x1d5   : > { %v4694_v47 = vadd.f32 %v2464_v33, %v2408_v58 }
 0x1d6   : > { %v2405_v41 = vpop.f32.mrf.mxu0  ;;  %v2600_v45 = vpop.f32.mrf.mxu1 }
 0x1d7   : > { %v2489_v54 = vmul.f32 %v4694_v47, %v4694_v47  ;;  %v2471_v14 = vpack.c.bf16 %v4694_v47, %v4694_v47 }
 0x1d8   : > { %v3814_v48 = vpop.f32.mrf.mxu0  ;;  %v3832_v2 = vpop.f32.mrf.mxu1 }
 0x1d9   : > { %v2490_v16 = vsel %vm704_vm5, %v2489_v54, 0.0  ;;  %v2479_v1 = vrot.slane %v2471_v14, %v4055_v7  ;;  %v2485_v48 = vsel %vm704_vm5, %v4694_v47, 0.0 }
 0x1da   : > { %2491 = vadd.xlane.f32.xlu0 %v2490_v16  ;;  %v2551_v20 = vpop.f32.mrf.mxu0  ;;  %v2708_v62 = vpop.f32.mrf.mxu1 }
 0x1db   : > { %v2598_v13 = vadd.f32 %v2597_v37, %v2551_v20 }
 0x1dc   : > { %v3825_v52 = vpop.f32.mrf.mxu0  ;;  %v3843_v56 = vpop.f32.mrf.mxu1 }
 0x1de   : > { %v2554_v4 = vpop.f32.mrf.mxu0  ;;  %v2711_v49 = vpop.f32.mrf.mxu1 }
 0x1e0   : > { %2124 = vrot.lane.b32.xlu1 %v2123_v8, %s3988_s6  ;;  %v3826_v3 = vpop.f32.mrf.mxu0  ;;  %v3844_v63 = vpop.f32.mrf.mxu1 }
 0x1e2   : > { %v2646_v9 = vpop.f32.mrf.mxu0  ;;  %v2820_v17 = vpop.f32.mrf.mxu1 }
 0x1e3   : > { %v2652_v27 = vadd.f32 %v2646_v9, %v2598_v13 }
 0x1e4   : > { %v3837_v11 = vpop.f32.mrf.mxu0  ;;  %v3855_v53 = vpop.f32.mrf.mxu1 }
 0x1e5   : > { %v2714_v50 = vadd.f32 %v2708_v62, %v2652_v27 }
 0x1e6   : > { %v2649_v57 = vpop.f32.mrf.mxu0  ;;  %v2823_v21 = vpop.f32.mrf.mxu1 }
 0x1e8   : > { %v3838_v60 = vpop.f32.mrf.mxu0  ;;  %v3856_v24 = vpop.f32.mrf.mxu1 }
 0x1e9   : > { %v707_v55 = vpop.xlane.xlu0 %706 }
 0x1ea   : > { %v2758_v0 = vpop.f32.mrf.mxu0  ;;  %v2953_v5 = vpop.f32.mrf.mxu1 }
 0x1eb   : > { %v712_v35 = vpop.xlane.xlu1 %711  ;;  %v2764_v43 = vadd.f32 %v2758_v0, %v2714_v50 }
 0x1ec   : > { %v3849_v61 = vpop.f32.mrf.mxu0  ;;  %v3867_v15 = vpop.f32.mrf.mxu1 }
 0x1ed   : > { %v1057_v28 = vpop.permute.xlu0 %1056  ;;  %v2826_v45 = vadd.f32 %v2820_v17, %v2764_v43 }
 0x1ee   : > { %1060 = vst.msk [vmem:[%s4678_s26] sm:$0x3] %vm1059_vm7, %v1057_v28  ;;  %v2761_v32 = vpop.f32.mrf.mxu0  ;;  %v2956_v6 = vpop.f32.mrf.mxu1 }
 0x1ef   : > { %v2841_v56 = vsel %vm704_vm5, %v2826_v45, 0.0  ;;  %v2845_v4 = vmul.f32 %v2826_v45, %v2826_v45  ;;  %v2827_v53 = vpack.c.bf16 %v2826_v45, %v2826_v45 }
 0x1f0   : > { %2480 = vrot.lane.b32.xlu0 %v2479_v1, %s3989_s7  ;;  %v3850_v22 = vpop.f32.mrf.mxu0  ;;  %v3868_v12 = vpop.f32.mrf.mxu1 }
 0x1f1   : > { %v2846_v3 = vsel %vm704_vm5, %v2845_v4, 0.0  ;;  %v2835_v60 = vrot.slane %v2827_v53, %v4055_v7 }
 0x1f2   : > { %v2907_v25 = vpop.f32.mrf.mxu0  ;;  %v3064_v23 = vpop.f32.mrf.mxu1 }
 0x1f3   : > { %v2954_v33 = vadd.f32 %v2953_v5, %v2907_v25 }
 0x1f4   : > { %v3861_v18 = vpop.f32.mrf.mxu0  ;;  %v3879_v26 = vpop.f32.mrf.mxu1 }
 0x1f6   : > { %v2910_v30 = vpop.f32.mrf.mxu0  ;;  %v3067_v29 = vpop.f32.mrf.mxu1 }
 0x1f8   : > { %v3862_v31 = vpop.f32.mrf.mxu0  ;;  %v3880_v19 = vpop.f32.mrf.mxu1 }
 0x1fa   : > { %v3002_v34 = vpop.f32.mrf.mxu0  ;;  %v3175_v36 = vpop.f32.mrf.mxu1 }
 0x1fb   : > { %v3008_v39 = vadd.f32 %v3002_v34, %v2954_v33 }
 0x1fc   : > { %v3873_v38 = vpop.f32.mrf.mxu0  ;;  %v3891_v42 = vpop.f32.mrf.mxu1 }
 0x1fd   : > { %v3070_v10 = vadd.f32 %v3064_v23, %v3008_v39 }
 0x1fe   : > { %v3005_v40 = vpop.f32.mrf.mxu0  ;;  %v3178_v44 = vpop.f32.mrf.mxu1 }
 0x200   : > { %v3874_v51 = vpop.f32.mrf.mxu0  ;;  %v3892_v58 = vpop.f32.mrf.mxu1 }
 0x201   : > { %v1063_v37 = vpop.xlane.xlu1 %1062 }
 0x202   : > { %v1064_v46 = vadd.f32 %v1063_v37, %v707_v55  ;;  %v3113_v41 = vpop.f32.mrf.mxu0 }
 0x203   : > { %v3119_v54 = vadd.f32 %v3113_v41, %v3070_v10 }
 0x204   : > { %2486 = vadd.xlane.f32.xlu1 %v2485_v48  ;;  %v3885_v2 = vpop.f32.mrf.mxu0 }
 0x205   : > { %v3181_v16 = vadd.f32 %v3175_v36, %v3119_v54  ;;  %v1068_v59 = vpop.xlane.xlu1 %1067 }
 0x206   : > { %v1069_v20 = vadd.f32 %v1068_v59, %v712_v35  ;;  %v3116_v62 = vpop.f32.mrf.mxu0 }
 0x207   : > { %v3182_v52 = vpack.c.bf16 %v3181_v16, %v3181_v16  ;;  %v3196_v47 = vsel %vm704_vm5, %v3181_v16, 0.0  ;;  %v3200_v63 = vmul.f32 %v3181_v16, %v3181_v16 }
 0x208   : > { %2842 = vadd.xlane.f32.xlu1 %v2841_v56  ;;  %v3886_v8 = vpop.f32.mrf.mxu0 }
 0x209   : > { %v3190_v49 = vrot.slane %v3182_v52, %v4055_v7  ;;  %v3201_v9 = vsel %vm704_vm5, %v3200_v63, 0.0 }
 0x20b   : > { %3191 = vrot.lane.b32.xlu0 %v3190_v49, %s3990_s9 }
 0x20c   : > { %2847 = vadd.xlane.f32.xlu1 %v2846_v3 }
 0x210   : > { %3197 = vadd.xlane.f32.xlu1 %v3196_v47 }
 0x214   : > { %3202 = vadd.xlane.f32.xlu1 %v3201_v9 }
 0x21b   : > { %v1424_v17 = vpop.xlane.xlu1 %1423 }
 0x21c   : > { %v1425_v11 = vadd.f32 %v1424_v17, %v1069_v20 }
 0x21f   : > { %v1413_v57 = vpop.permute.xlu1 %1412 }
 0x220   : > { %1416 = vst.msk [vmem:[%s4678_s26] sm:$0x3] %vm1415_vm8, %v1413_v57 }
 0x223   : > { %v1419_v21 = vpop.xlane.xlu0 %1418 }
 0x224   : > { %v1420_v24 = vadd.f32 %v1419_v21, %v1064_v46 }
 0x225   : > { %2836 = vrot.lane.b32.xlu1 %v2835_v60, %s3991_s10 }
 0x227   : > { %v1769_v55 = vpop.permute.xlu0 %1768 }
 0x228   : > { %1772 = vst.msk [vmem:[%s4678_s26] sm:$0x3] %vm1771_vm9, %v1769_v55 }
 0x250   : > { %v1775_v14 = vpop.xlane.xlu1 %1774 }
 0x251   : > { %v1776_v0 = vadd.f32 %v1775_v14, %v1420_v24 }
 0x254   : > { %v1780_v5 = vpop.xlane.xlu1 %1779 }
 0x255   : > { %v1781_v61 = vadd.f32 %v1780_v5, %v1425_v11 }
 0x258   : > { %v2136_v15 = vpop.xlane.xlu1 %2135  ;;  %v2131_v32 = vpop.xlane.xlu0 %2130 }
 0x259   : > { %v2132_v12 = vadd.f32 %v2131_v32, %v1776_v0  ;;  %v2137_v18 = vadd.f32 %v2136_v15, %v1781_v61 }
 0x25c   : > { %v2125_v28 = vpop.permute.xlu1 %2124 }
 0x25d   : > { %2128 = vst.msk [vmem:[%s4678_s26] sm:$0x3] %vm2127_vm10, %v2125_v28 }
 0x263   : > { %v2492_v1 = vpop.xlane.xlu0 %2491 }
 0x264   : > { %v2493_v30 = vadd.f32 %v2492_v1, %v2137_v18 }
 0x267   : > { %v2481_v7 = vpop.permute.xlu0 %2480 }
 0x268   : > { %2484 = vst.msk [vmem:[%s4678_s26] sm:$0x3] %vm2483_vm11, %v2481_v7 }
 0x27d   : > { %v3192_v34 = vpop.permute.xlu0 %3191 }
 0x28d   : > { %v2487_v6 = vpop.xlane.xlu1 %2486 }
 0x28e   : > { %v2488_v23 = vadd.f32 %v2487_v6, %v2132_v12 }
 0x291   : > { %v2843_v22 = vpop.xlane.xlu1 %2842 }
 0x292   : > { %v2844_v26 = vadd.f32 %v2843_v22, %v2488_v23 }
 0x295   : > { %v2848_v25 = vpop.xlane.xlu1 %2847 }
 0x296   : > { %v2849_v31 = vadd.f32 %v2848_v25, %v2493_v30 }
 0x299   : > { %v3198_v13 = vpop.xlane.xlu1 %3197 }
 0x29a   : > { %v3199_v29 = vadd.f32 %v3198_v13, %v2844_v26 }
 0x29c   : > { %3206 = vst.msk [vmem:[%s353_s14] sm:$0xf] %vm3205_vm12, %v3199_v29 }
 0x29d   : > { %v3203_v19 = vpop.xlane.xlu1 %3202 }
 0x29e   : > { %v3204_v27 = vadd.f32 %v3203_v19, %v2849_v31 }
 0x2a0   : > { %3207 = vst.msk [vmem:[%s360_s17] sm:$0xf] %vm3205_vm12, %v3204_v27 }
 0x2a1   : > { %v2837_v33 = vpop.permute.xlu1 %2836 }
 0x2a2   : > { %2840 = vst.msk [vmem:[%s4678_s26] sm:$0x3] %vm2839_vm13, %v2837_v33 }
 0x2a3   : > { %3195 = vst.msk [vmem:[%s4678_s26] sm:$0x3] %vm3194_vm14, %v3192_v34 }
 0x2a4 PF: > { %s16_s20 = sadd.s32 1, %s3978_s20   ;;  %s4740_s18 = smov %s3974_s19 }
 0x2a5   : > { %p13_p5 = scmp.ge.s32.totalorder %s16_s20, 4   ;;  %s4741_s19 = smov %s4743_s21 }
 0x2a7   :  { %15 = sbr.rel (!%p13_p5) target bundleno = 2 (0x2), region = 106 }

</bundles_post_ra>
